<compile_context>
chip_gen: v7x
topology: tpu7x:2x2x1
jax: 0.10.0
libtpu: 0.0.40
codegen_flags: <defaults>
</compile_context>

<pallas_src>
import jax
import jax.numpy as jnp
from jax.experimental import pallas as pl
from jax.experimental.pallas import tpu as pltpu

# ---- model hyper-parameters (small, synthetic DINOv2) ----
NUM_CLASSES = 37          # len(cheese_list)
CLASS_PAD = 128           # lane-dense padded classifier width
EMBED = 32                # hidden size D
HEADS = 2
HEAD_DIM = EMBED // HEADS
MLP_DIM = 4 * EMBED
LAYERS = 2
PATCH = 8
IMG_SIZE = 16
IN_CHANS = 3
P_TOKENS = (IMG_SIZE // PATCH) ** 2        # 4 patches / image
N_TOKENS = P_TOKENS + 1                    # + CLS = 5 real tokens
NP = 8                                     # tokens padded to a sublane multiple
K_FLAT = IN_CHANS * PATCH * PATCH          # 192
EPS = 1e-6

# TODO(synk): easyocr text reading + fuzzy matching (tag_identifier) has no
# Pallas / tensor equivalent; the OCR override of logits is not implemented.


def _bf16(x):
    return x.astype(jnp.bfloat16)


def _layernorm(z, g, b):
    mu = jnp.mean(z, axis=-1, keepdims=True)
    var = jnp.mean((z - mu) ** 2, axis=-1, keepdims=True)
    return (z - mu) * jax.lax.rsqrt(var + EPS) * g + b


# -------------------- fused per-image Pallas kernel --------------------

def fused_vit_kernel(
    patches_ref,                 # (1, NP, K)   bf16  per-image padded patches
    patch_w_ref,                 # (K, D)       bf16
    pos_ref,                     # (NP, D)      f32   pos (+patch bias, +cls row0, 0 pad)
    ln1g_ref, ln1b_ref,          # (L, 1, D)    f32
    wqkv_ref,                    # (L, D, 3D)   bf16  fused qkv, scale folded in q
    bqkv_ref,                    # (L, 1, 3D)   f32
    prw_ref,                     # (L, D, D)    bf16
    prb_ref,                     # (L, 1, D)    f32
    ln2g_ref, ln2b_ref,          # (L, 1, D)    f32
    w1_ref,                      # (L, D, MLP)  bf16
    b1_ref,                      # (L, 1, MLP)  f32
    w2_ref,                      # (L, MLP, D)  bf16
    b2_ref,                      # (L, 1, D)    f32
    lnfg_ref, lnfb_ref,          # (1, D)       f32
    hw_ref,                      # (D, CLASS_PAD) bf16
    hb_ref,                      # (1, CLASS_PAD) f32
    o_ref,                       # (NP, CLASS_PAD) f32
):
    # Key-column mask built in-kernel (static sizes; a few VPU ops, no HBM
    # DMA).  Padded key columns (>= N_TOKENS) get -1e30; every query row keeps
    # N_TOKENS unmasked columns, so no softmax row is all-masked (no 0/0 NaN).
    col = jax.lax.broadcasted_iota(jnp.int32, (NP, NP), 1)
    key_bias = jnp.where(col < N_TOKENS, 0.0, -1e30).astype(jnp.float32)

    # ---- patch embedding (CLS + pad rows are zero patches; their token value
    #      is carried entirely by pos_ref) ----
    x = jnp.dot(patches_ref[0], patch_w_ref[...],
                preferred_element_type=jnp.float32) + pos_ref[...]   # (NP, D)

    # ---- transformer blocks, statically unrolled (activations stay in VMEM) ----
    for l in range(LAYERS):
        h1 = _bf16(_layernorm(x, ln1g_ref[l], ln1b_ref[l]))
        # One fused qkv matmul per layer (instead of 6 tiny per-head dots);
        # the 1/sqrt(head_dim) scale is pre-folded into the q weights/bias.
        qkv = jnp.dot(h1, wqkv_ref[l],
                      preferred_element_type=jnp.float32) + bqkv_ref[l]
        heads = []
        for hh in range(HEADS):
            off = hh * HEAD_DIM
            q = qkv[:, off:off + HEAD_DIM]
            k = qkv[:, EMBED + off:EMBED + off + HEAD_DIM]
            v = qkv[:, 2 * EMBED + off:2 * EMBED + off + HEAD_DIM]
            # NOTE: contracting (1,1) still makes Mosaic present k^T to the
            # MXU (an implicit XLU transpose) -- negligible at NP=8 tokens.
            s = jax.lax.dot_general(
                _bf16(q), _bf16(k),
                dimension_numbers=(((1,), (1,)), ((), ())),
                preferred_element_type=jnp.float32) + key_bias
            s = s - jnp.max(s, axis=-1, keepdims=True)
            p = jnp.exp(s)
            # Approx reciprocal (EUP slot); ~1e-3 rel error, fine for logits.
            p = p * pl.reciprocal(jnp.sum(p, axis=-1, keepdims=True),
                                  approx=True)
            heads.append(jnp.dot(_bf16(p), _bf16(v),
                                 preferred_element_type=jnp.float32))
        # Single (D, D) output projection on the concatenated heads.
        attn = jnp.dot(_bf16(jnp.concatenate(heads, axis=-1)), prw_ref[l],
                       preferred_element_type=jnp.float32) + prb_ref[l]
        x = x + attn

        h2 = _bf16(_layernorm(x, ln2g_ref[l], ln2b_ref[l]))
        m = jnp.dot(h2, w1_ref[l],
                    preferred_element_type=jnp.float32) + b1_ref[l]
        # tanh-GELU routes through the EUP; tiny deviation from erf GELU.
        m = jax.nn.gelu(m, approximate=True)
        m = jnp.dot(_bf16(m), w2_ref[l],
                    preferred_element_type=jnp.float32) + b2_ref[l]
        x = x + m

    # ---- final LayerNorm + classifier.  The tile is 8 sublanes (one vreg row
    #      group), so running the head on all rows costs the same as CLS-only;
    #      the host slices row 0.  Classes padded to 128 -> lane-dense store. ----
    hf = _layernorm(x, lnfg_ref[...], lnfb_ref[...])
    o_ref[...] = jnp.dot(_bf16(hf), hw_ref[...],
                         preferred_element_type=jnp.float32) + hb_ref[...]


# -------------------- wrappers --------------------

def _const_index_map(nd):
    def idx(i):
        return (0,) * nd
    return idx


def _resident(arr):
    """Full-array BlockSpec with a constant block index: the weight is DMA'd
    once and stays VMEM-resident across all grid steps."""
    return pl.BlockSpec(arr.shape, _const_index_map(arr.ndim))


def dinov2_forward(params, x):
    """x: (B, C, H, W) float32 NCHW (PyTorch convention) -> (B, NUM_CLASSES)."""
    B, C, H, W = x.shape
    assert (C, H, W) == (IN_CHANS, IMG_SIZE, IMG_SIZE)
    p = PATCH

    # Non-overlapping patches, flattened in (C, ph, pw) order to match a
    # PyTorch Conv2d(kernel=stride=patch) patch embedding.
    patches = (x.reshape(B, C, H // p, p, W // p, p)
                 .transpose(0, 2, 4, 1, 3, 5)
                 .reshape(B, P_TOKENS, K_FLAT))
    # Row 0 (CLS slot) and rows N_TOKENS..NP-1 (sublane padding) are zero
    # patches; CLS value / patch bias / pos emb are folded into pos_eff.
    padded = jnp.zeros((B, NP, K_FLAT), jnp.float32)
    padded = padded.at[:, 1:1 + P_TOKENS].set(patches)
    padded = padded.astype(jnp.bfloat16)

    weights = (
        params["patch_w"], params["pos_eff"],
        params["ln1_g"], params["ln1_b"],
        params["wqkv"], params["bqkv"],
        params["proj_w"], params["proj_b"],
        params["ln2_g"], params["ln2_b"],
        params["mlp_w1"], params["mlp_b1"],
        params["mlp_w2"], params["mlp_b2"],
        params["ln_g"], params["ln_b"],
        params["head_w"], params["head_b"],
    )

    grid_spec = pltpu.PrefetchScalarGridSpec(
        num_scalar_prefetch=0,
        grid=(B,),   # one image per grid step; attention is strictly per-image
        in_specs=[pl.BlockSpec((1, NP, K_FLAT), lambda i: (i, 0, 0))]
                 + [_resident(w) for w in weights],
        out_specs=pl.BlockSpec((NP, CLASS_PAD), lambda i: (i, 0)),
    )

    out = pl.pallas_call(
        fused_vit_kernel,
        out_shape=jax.ShapeDtypeStruct((B * NP, CLASS_PAD), jnp.float32),
        grid_spec=grid_spec,
        compiler_params=pltpu.CompilerParams(
            # Batch axis is embarrassingly parallel -> both TCs on v7x.
            dimension_semantics=("parallel",),
            # Explicit, generation-safe VMEM budget (well under v7x's 64 MiB).
            vmem_limit_bytes=32 * 1024 * 1024,
        ),
    )(padded, *weights)

    return out.reshape(B, NP, CLASS_PAD)[:, 0, :NUM_CLASSES]


def init_params(key, in_chans=IN_CHANS, img_size=IMG_SIZE):
    """Deterministic synthetic DINOv2 parameters (packed PyTorch layout)."""
    K = in_chans * PATCH * PATCH
    n_tokens = 1 + (img_size // PATCH) ** 2
    keys = jax.random.split(key, 4 + 4 * LAYERS)
    ki = iter(keys)

    def nrm(k, shape, scale=0.02):
        return scale * jax.random.normal(k, shape, dtype=jnp.float32)

    params = {
        "patch_w": nrm(next(ki), (K, EMBED)),
        "patch_b": jnp.zeros((EMBED,), jnp.float32),
        "cls": nrm(next(ki), (EMBED,)),
        "pos": nrm(next(ki), (n_tokens, EMBED)),
        "ln_g": jnp.ones((EMBED,), jnp.float32),
        "ln_b": jnp.zeros((EMBED,), jnp.float32),
        "head_w": nrm(next(ki), (EMBED, NUM_CLASSES)),
        "head_b": jnp.zeros((NUM_CLASSES,), jnp.float32),
        "blocks": [],
    }
    for _ in range(LAYERS):
        params["blocks"].append({
            "ln1_g": jnp.ones((EMBED,), jnp.float32),
            "ln1_b": jnp.zeros((EMBED,), jnp.float32),
            "qkv_w": nrm(next(ki), (EMBED, 3 * EMBED)),
            "qkv_b": jnp.zeros((3 * EMBED,), jnp.float32),
            "proj_w": nrm(next(ki), (EMBED, EMBED)),
            "proj_b": jnp.zeros((EMBED,), jnp.float32),
            "ln2_g": jnp.ones((EMBED,), jnp.float32),
            "ln2_b": jnp.zeros((EMBED,), jnp.float32),
            "mlp_w1": nrm(next(ki), (EMBED, MLP_DIM)),
            "mlp_b1": jnp.zeros((MLP_DIM,), jnp.float32),
            "mlp_w2": nrm(next(ki), (MLP_DIM, EMBED)),
            "mlp_b2": jnp.zeros((EMBED,), jnp.float32),
        })
    return params


def prepare_params(raw):
    """Convert packed PyTorch-style params into the fused-kernel layout:
    layer-stacked arrays, fused qkv with 1/sqrt(head_dim) folded into the q
    weights/bias, bf16 MXU operands, lane-dense (padded) classifier, and
    CLS / patch-bias / padding folded into a (NP, D) pos_eff."""
    scale = 1.0 / (HEAD_DIM ** 0.5)
    blocks = raw["blocks"]

    def stack(fn):
        return jnp.stack([fn(blk) for blk in blocks])

    def qkv_w(blk):
        w = blk["qkv_w"]                       # (D, 3D), [q|k|v] along lanes
        w = w.at[:, :EMBED].multiply(scale)    # fold softmax scale into q
        return _bf16(w)

    def qkv_b(blk):
        b = blk["qkv_b"]
        b = b.at[:EMBED].multiply(scale)
        return b[None, :].astype(jnp.float32)  # (1, 3D)

    # pos_eff row 0       : pos[0] + cls       (CLS slot is a zero patch)
    # pos_eff rows 1..N-1 : pos[i] + patch_b   (patch bias folded in)
    # pos_eff rows N..NP-1: 0                  (sublane padding rows)
    pos_eff = raw["pos"] + raw["patch_b"][None, :]
    pos_eff = pos_eff.at[0].set(raw["pos"][0] + raw["cls"])
    pos_eff = jnp.zeros((NP, EMBED), jnp.float32).at[:N_TOKENS].set(pos_eff)

    head_w = jnp.zeros((EMBED, CLASS_PAD), jnp.float32)
    head_w = head_w.at[:, :NUM_CLASSES].set(raw["head_w"])
    head_b = jnp.zeros((1, CLASS_PAD), jnp.float32)
    head_b = head_b.at[0, :NUM_CLASSES].set(raw["head_b"])

    return {
        "patch_w": _bf16(raw["patch_w"]),                       # (K, D)
        "pos_eff": pos_eff,                                     # (NP, D)
        "ln1_g": stack(lambda b: b["ln1_g"][None, :]),          # (L, 1, D)
        "ln1_b": stack(lambda b: b["ln1_b"][None, :]),
        "wqkv": stack(qkv_w),                                   # (L, D, 3D) bf16
        "bqkv": stack(qkv_b),                                   # (L, 1, 3D)
        "proj_w": stack(lambda b: _bf16(b["proj_w"])),          # (L, D, D) bf16
        "proj_b": stack(lambda b: b["proj_b"][None, :]),        # (L, 1, D)
        "ln2_g": stack(lambda b: b["ln2_g"][None, :]),
        "ln2_b": stack(lambda b: b["ln2_b"][None, :]),
        "mlp_w1": stack(lambda b: _bf16(b["mlp_w1"])),          # (L, D, MLP)
        "mlp_b1": stack(lambda b: b["mlp_b1"][None, :]),        # (L, 1, MLP)
        "mlp_w2": stack(lambda b: _bf16(b["mlp_w2"])),          # (L, MLP, D)
        "mlp_b2": stack(lambda b: b["mlp_b2"][None, :]),        # (L, 1, D)
        "ln_g": raw["ln_g"][None, :],                           # (1, D)
        "ln_b": raw["ln_b"][None, :],
        "head_w": _bf16(head_w),                                # (D, 128)
        "head_b": head_b,                                       # (1, 128)
    }


if __name__ == "__main__":
    key = jax.random.PRNGKey(0)
    pkey, xkey = jax.random.split(key)
    raw_params = init_params(pkey)
    params = prepare_params(raw_params)

    # Small NCHW image batch, consistent with the module's image input.
    x = jax.random.uniform(xkey, (2, 3, 16, 16), dtype=jnp.float32)

    logits = dinov2_forward(params, x)
    logits = jax.block_until_ready(logits)
    assert logits.shape == (2, NUM_CLASSES)
    assert bool(jnp.all(jnp.isfinite(logits)))
    print("KERNEL_OK")
</pallas_src>

<mosaic_0001>
module attributes {stable_mosaic.version = 11 : i64} {
  func.func @fused_vit_kernel(%arg0: i32, %arg1: memref<1x8x192xbf16, #tpu.memory_space<vmem>>, %arg2: memref<192x32xbf16, #tpu.memory_space<vmem>>, %arg3: memref<8x32xf32, #tpu.memory_space<vmem>>, %arg4: memref<2x1x32xf32, #tpu.memory_space<vmem>>, %arg5: memref<2x1x32xf32, #tpu.memory_space<vmem>>, %arg6: memref<2x32x96xbf16, #tpu.memory_space<vmem>>, %arg7: memref<2x1x96xf32, #tpu.memory_space<vmem>>, %arg8: memref<2x32x32xbf16, #tpu.memory_space<vmem>>, %arg9: memref<2x1x32xf32, #tpu.memory_space<vmem>>, %arg10: memref<2x1x32xf32, #tpu.memory_space<vmem>>, %arg11: memref<2x1x32xf32, #tpu.memory_space<vmem>>, %arg12: memref<2x32x128xbf16, #tpu.memory_space<vmem>>, %arg13: memref<2x1x128xf32, #tpu.memory_space<vmem>>, %arg14: memref<2x128x32xbf16, #tpu.memory_space<vmem>>, %arg15: memref<2x1x32xf32, #tpu.memory_space<vmem>>, %arg16: memref<1x32xf32, #tpu.memory_space<vmem>>, %arg17: memref<1x32xf32, #tpu.memory_space<vmem>>, %arg18: memref<32x128xbf16, #tpu.memory_space<vmem>>, %arg19: memref<1x128xf32, #tpu.memory_space<vmem>>, %arg20: memref<8x128xf32, #tpu.memory_space<vmem>>) attributes {dimension_semantics = [#tpu.dimension_semantics<parallel>], iteration_bounds = array<i64: 2>, scalar_prefetch = 0 : i64, scratch_operands = 0 : i64, tpu.core_type = #tpu.core_type<tc>, window_params = [{transform_indices = @transform_0, window_bounds = array<i64: 1, 8, 192>}, {pipeline_mode = #tpu.pipeline_mode<synchronous>, transform_indices = @transform_1, window_bounds = array<i64: 192, 32>}, {pipeline_mode = #tpu.pipeline_mode<synchronous>, transform_indices = @transform_2, window_bounds = array<i64: 8, 32>}, {pipeline_mode = #tpu.pipeline_mode<synchronous>, transform_indices = @transform_3, window_bounds = array<i64: 2, 1, 32>}, {pipeline_mode = #tpu.pipeline_mode<synchronous>, transform_indices = @transform_4, window_bounds = array<i64: 2, 1, 32>}, {pipeline_mode = #tpu.pipeline_mode<synchronous>, transform_indices = @transform_5, window_bounds = array<i64: 2, 32, 96>}, {pipeline_mode = #tpu.pipeline_mode<synchronous>, transform_indices = @transform_6, window_bounds = array<i64: 2, 1, 96>}, {pipeline_mode = #tpu.pipeline_mode<synchronous>, transform_indices = @transform_7, window_bounds = array<i64: 2, 32, 32>}, {pipeline_mode = #tpu.pipeline_mode<synchronous>, transform_indices = @transform_8, window_bounds = array<i64: 2, 1, 32>}, {pipeline_mode = #tpu.pipeline_mode<synchronous>, transform_indices = @transform_9, window_bounds = array<i64: 2, 1, 32>}, {pipeline_mode = #tpu.pipeline_mode<synchronous>, transform_indices = @transform_10, window_bounds = array<i64: 2, 1, 32>}, {pipeline_mode = #tpu.pipeline_mode<synchronous>, transform_indices = @transform_11, window_bounds = array<i64: 2, 32, 128>}, {pipeline_mode = #tpu.pipeline_mode<synchronous>, transform_indices = @transform_12, window_bounds = array<i64: 2, 1, 128>}, {pipeline_mode = #tpu.pipeline_mode<synchronous>, transform_indices = @transform_13, window_bounds = array<i64: 2, 128, 32>}, {pipeline_mode = #tpu.pipeline_mode<synchronous>, transform_indices = @transform_14, window_bounds = array<i64: 2, 1, 32>}, {pipeline_mode = #tpu.pipeline_mode<synchronous>, transform_indices = @transform_15, window_bounds = array<i64: 1, 32>}, {pipeline_mode = #tpu.pipeline_mode<synchronous>, transform_indices = @transform_16, window_bounds = array<i64: 1, 32>}, {pipeline_mode = #tpu.pipeline_mode<synchronous>, transform_indices = @transform_17, window_bounds = array<i64: 32, 128>}, {pipeline_mode = #tpu.pipeline_mode<synchronous>, transform_indices = @transform_18, window_bounds = array<i64: 1, 128>}, {transform_indices = @transform_19, window_bounds = array<i64: 8, 128>}]} {
    %0 = tpu.iota {dimensions = array<i32: 1>} : vector<8x8xi32>
    %c5_i32 = arith.constant 5 : i32
    %1 = vector.broadcast %c5_i32 : i32 to vector<8x8xi32>
    %2 = arith.cmpi slt, %0, %1 : vector<8x8xi32>
    %cst = arith.constant 0.000000e+00 : f32
    %cst_0 = arith.constant -1.000000e+30 : f32
    %3 = vector.broadcast %cst : f32 to vector<8x8xf32>
    %4 = vector.broadcast %cst_0 : f32 to vector<8x8xf32>
    %5 = arith.select %2, %3, %4 : vector<8x8xi1>, vector<8x8xf32>
    %c0 = arith.constant 0 : index
    %c0_1 = arith.constant 0 : index
    %c0_2 = arith.constant 0 : index
    %6 = vector.load %arg1[%c0, %c0_1, %c0_2] : memref<1x8x192xbf16, #tpu.memory_space<vmem>>, vector<1x8x192xbf16>
    %7 = vector.shape_cast %6 : vector<1x8x192xbf16> to vector<8x192xbf16>
    %c0_3 = arith.constant 0 : index
    %c0_4 = arith.constant 0 : index
    %8 = vector.load %arg2[%c0_3, %c0_4] : memref<192x32xbf16, #tpu.memory_space<vmem>>, vector<192x32xbf16>
    %cst_5 = arith.constant dense<0.000000e+00> : vector<8x32xf32>
    %9 = tpu.matmul %7, %8, %cst_5 {dimension_numbers = #tpu.dot_dimension_numbers<[1], [0], [0], [1], [0, 0, 1, 1], [], []>} : vector<8x192xbf16>, vector<192x32xbf16>, vector<8x32xf32> -> vector<8x32xf32>
    %c0_6 = arith.constant 0 : index
    %c0_7 = arith.constant 0 : index
    %10 = vector.load %arg3[%c0_6, %c0_7] : memref<8x32xf32, #tpu.memory_space<vmem>>, vector<8x32xf32>
    %11 = arith.addf %9, %10 : vector<8x32xf32>
    %c0_8 = arith.constant 0 : index
    %c0_9 = arith.constant 0 : index
    %c0_10 = arith.constant 0 : index
    %12 = vector.load %arg4[%c0_8, %c0_9, %c0_10] : memref<2x1x32xf32, #tpu.memory_space<vmem>>, vector<1x1x32xf32>
    %13 = vector.shape_cast %12 : vector<1x1x32xf32> to vector<1x32xf32>
    %c0_11 = arith.constant 0 : index
    %c0_12 = arith.constant 0 : index
    %c0_13 = arith.constant 0 : index
    %14 = vector.load %arg5[%c0_11, %c0_12, %c0_13] : memref<2x1x32xf32, #tpu.memory_space<vmem>>, vector<1x1x32xf32>
    %15 = vector.shape_cast %14 : vector<1x1x32xf32> to vector<1x32xf32>
    %cst_14 = arith.constant dense<0.000000e+00> : vector<8xf32>
    %16 = vector.multi_reduction <add>, %11, %cst_14 [1] : vector<8x32xf32> to vector<8xf32>
    %17 = vector.shape_cast %16 : vector<8xf32> to vector<8x1xf32>
    %cst_15 = arith.constant 3.200000e+01 : f32
    %18 = vector.broadcast %cst_15 : f32 to vector<8x1xf32>
    %19 = arith.divf %17, %18 : vector<8x1xf32>
    %20 = vector.broadcast %19 : vector<8x1xf32> to vector<8x32xf32>
    %21 = arith.subf %11, %20 : vector<8x32xf32>
    %22 = arith.mulf %21, %21 : vector<8x32xf32>
    %cst_16 = arith.constant dense<0.000000e+00> : vector<8xf32>
    %23 = vector.multi_reduction <add>, %22, %cst_16 [1] : vector<8x32xf32> to vector<8xf32>
    %24 = vector.shape_cast %23 : vector<8xf32> to vector<8x1xf32>
    %cst_17 = arith.constant 3.200000e+01 : f32
    %25 = vector.broadcast %cst_17 : f32 to vector<8x1xf32>
    %26 = arith.divf %24, %25 : vector<8x1xf32>
    %27 = vector.broadcast %19 : vector<8x1xf32> to vector<8x32xf32>
    %28 = arith.subf %11, %27 : vector<8x32xf32>
    %cst_18 = arith.constant 9.99999997E-7 : f32
    %29 = vector.broadcast %cst_18 : f32 to vector<8x1xf32>
    %30 = arith.addf %26, %29 : vector<8x1xf32>
    %31 = math.rsqrt %30 : vector<8x1xf32>
    %32 = vector.broadcast %31 : vector<8x1xf32> to vector<8x32xf32>
    %33 = arith.mulf %28, %32 : vector<8x32xf32>
    %34 = vector.broadcast %13 : vector<1x32xf32> to vector<8x32xf32>
    %35 = arith.mulf %33, %34 : vector<8x32xf32>
    %36 = vector.broadcast %15 : vector<1x32xf32> to vector<8x32xf32>
    %37 = arith.addf %35, %36 : vector<8x32xf32>
    %38 = arith.truncf %37 : vector<8x32xf32> to vector<8x32xbf16>
    %c0_19 = arith.constant 0 : index
    %c0_20 = arith.constant 0 : index
    %c0_21 = arith.constant 0 : index
    %39 = vector.load %arg6[%c0_19, %c0_20, %c0_21] : memref<2x32x96xbf16, #tpu.memory_space<vmem>>, vector<1x32x96xbf16>
    %40 = vector.shape_cast %39 : vector<1x32x96xbf16> to vector<32x96xbf16>
    %cst_22 = arith.constant dense<0.000000e+00> : vector<8x96xf32>
    %41 = tpu.matmul %38, %40, %cst_22 {dimension_numbers = #tpu.dot_dimension_numbers<[1], [0], [0], [1], [0, 0, 1, 1], [], []>} : vector<8x32xbf16>, vector<32x96xbf16>, vector<8x96xf32> -> vector<8x96xf32>
    %c0_23 = arith.constant 0 : index
    %c0_24 = arith.constant 0 : index
    %c0_25 = arith.constant 0 : index
    %42 = vector.load %arg7[%c0_23, %c0_24, %c0_25] : memref<2x1x96xf32, #tpu.memory_space<vmem>>, vector<1x1x96xf32>
    %43 = vector.shape_cast %42 : vector<1x1x96xf32> to vector<1x96xf32>
    %44 = vector.broadcast %43 : vector<1x96xf32> to vector<8x96xf32>
    %45 = arith.addf %41, %44 : vector<8x96xf32>
    %46 = vector.extract_strided_slice %45 {offsets = [0, 0], sizes = [8, 16], strides = [1, 1]} : vector<8x96xf32> to vector<8x16xf32>
    %47 = vector.extract_strided_slice %45 {offsets = [0, 32], sizes = [8, 16], strides = [1, 1]} : vector<8x96xf32> to vector<8x16xf32>
    %48 = vector.extract_strided_slice %45 {offsets = [0, 64], sizes = [8, 16], strides = [1, 1]} : vector<8x96xf32> to vector<8x16xf32>
    %49 = arith.truncf %46 : vector<8x16xf32> to vector<8x16xbf16>
    %50 = arith.truncf %47 : vector<8x16xf32> to vector<8x16xbf16>
    %cst_26 = arith.constant dense<0.000000e+00> : vector<8x8xf32>
    %51 = tpu.matmul %49, %50, %cst_26 {dimension_numbers = #tpu.dot_dimension_numbers<[1], [1], [0], [0], [0, 0, 1, 0], [], []>} : vector<8x16xbf16>, vector<8x16xbf16>, vector<8x8xf32> -> vector<8x8xf32>
    %52 = arith.addf %51, %5 : vector<8x8xf32>
    %cst_27 = arith.constant dense<0xFF800000> : vector<8xf32>
    %53 = vector.multi_reduction <maximumf>, %52, %cst_27 [1] : vector<8x8xf32> to vector<8xf32>
    %54 = vector.shape_cast %53 : vector<8xf32> to vector<8x1xf32>
    %55 = vector.broadcast %54 : vector<8x1xf32> to vector<8x8xf32>
    %56 = arith.subf %52, %55 : vector<8x8xf32>
    %57 = math.exp %56 : vector<8x8xf32>
    %cst_28 = arith.constant dense<0.000000e+00> : vector<8xf32>
    %58 = vector.multi_reduction <add>, %57, %cst_28 [1] : vector<8x8xf32> to vector<8xf32>
    %59 = vector.shape_cast %58 : vector<8xf32> to vector<8x1xf32>
    %60 = tpu.reciprocal %59 {approx = true} : vector<8x1xf32> -> vector<8x1xf32>
    %61 = vector.broadcast %60 : vector<8x1xf32> to vector<8x8xf32>
    %62 = arith.mulf %57, %61 : vector<8x8xf32>
    %63 = arith.truncf %62 : vector<8x8xf32> to vector<8x8xbf16>
    %64 = arith.truncf %48 : vector<8x16xf32> to vector<8x16xbf16>
    %cst_29 = arith.constant dense<0.000000e+00> : vector<8x16xf32>
    %65 = tpu.matmul %63, %64, %cst_29 {dimension_numbers = #tpu.dot_dimension_numbers<[1], [0], [0], [1], [0, 0, 1, 1], [], []>} : vector<8x8xbf16>, vector<8x16xbf16>, vector<8x16xf32> -> vector<8x16xf32>
    %66 = vector.extract_strided_slice %45 {offsets = [0, 16], sizes = [8, 16], strides = [1, 1]} : vector<8x96xf32> to vector<8x16xf32>
    %67 = vector.extract_strided_slice %45 {offsets = [0, 48], sizes = [8, 16], strides = [1, 1]} : vector<8x96xf32> to vector<8x16xf32>
    %68 = vector.extract_strided_slice %45 {offsets = [0, 80], sizes = [8, 16], strides = [1, 1]} : vector<8x96xf32> to vector<8x16xf32>
    %69 = arith.truncf %66 : vector<8x16xf32> to vector<8x16xbf16>
    %70 = arith.truncf %67 : vector<8x16xf32> to vector<8x16xbf16>
    %cst_30 = arith.constant dense<0.000000e+00> : vector<8x8xf32>
    %71 = tpu.matmul %69, %70, %cst_30 {dimension_numbers = #tpu.dot_dimension_numbers<[1], [1], [0], [0], [0, 0, 1, 0], [], []>} : vector<8x16xbf16>, vector<8x16xbf16>, vector<8x8xf32> -> vector<8x8xf32>
    %72 = arith.addf %71, %5 : vector<8x8xf32>
    %cst_31 = arith.constant dense<0xFF800000> : vector<8xf32>
    %73 = vector.multi_reduction <maximumf>, %72, %cst_31 [1] : vector<8x8xf32> to vector<8xf32>
    %74 = vector.shape_cast %73 : vector<8xf32> to vector<8x1xf32>
    %75 = vector.broadcast %74 : vector<8x1xf32> to vector<8x8xf32>
    %76 = arith.subf %72, %75 : vector<8x8xf32>
    %77 = math.exp %76 : vector<8x8xf32>
    %cst_32 = arith.constant dense<0.000000e+00> : vector<8xf32>
    %78 = vector.multi_reduction <add>, %77, %cst_32 [1] : vector<8x8xf32> to vector<8xf32>
    %79 = vector.shape_cast %78 : vector<8xf32> to vector<8x1xf32>
    %80 = tpu.reciprocal %79 {approx = true} : vector<8x1xf32> -> vector<8x1xf32>
    %81 = vector.broadcast %80 : vector<8x1xf32> to vector<8x8xf32>
    %82 = arith.mulf %77, %81 : vector<8x8xf32>
    %83 = arith.truncf %82 : vector<8x8xf32> to vector<8x8xbf16>
    %84 = arith.truncf %68 : vector<8x16xf32> to vector<8x16xbf16>
    %cst_33 = arith.constant dense<0.000000e+00> : vector<8x16xf32>
    %85 = tpu.matmul %83, %84, %cst_33 {dimension_numbers = #tpu.dot_dimension_numbers<[1], [0], [0], [1], [0, 0, 1, 1], [], []>} : vector<8x8xbf16>, vector<8x16xbf16>, vector<8x16xf32> -> vector<8x16xf32>
    %86 = tpu.concatenate %65, %85 in 1 : vector<8x16xf32>, vector<8x16xf32> -> vector<8x32xf32>
    %87 = arith.truncf %86 : vector<8x32xf32> to vector<8x32xbf16>
    %c0_34 = arith.constant 0 : index
    %c0_35 = arith.constant 0 : index
    %c0_36 = arith.constant 0 : index
    %88 = vector.load %arg8[%c0_34, %c0_35, %c0_36] : memref<2x32x32xbf16, #tpu.memory_space<vmem>>, vector<1x32x32xbf16>
    %89 = vector.shape_cast %88 : vector<1x32x32xbf16> to vector<32x32xbf16>
    %cst_37 = arith.constant dense<0.000000e+00> : vector<8x32xf32>
    %90 = tpu.matmul %87, %89, %cst_37 {dimension_numbers = #tpu.dot_dimension_numbers<[1], [0], [0], [1], [0, 0, 1, 1], [], []>} : vector<8x32xbf16>, vector<32x32xbf16>, vector<8x32xf32> -> vector<8x32xf32>
    %c0_38 = arith.constant 0 : index
    %c0_39 = arith.constant 0 : index
    %c0_40 = arith.constant 0 : index
    %91 = vector.load %arg9[%c0_38, %c0_39, %c0_40] : memref<2x1x32xf32, #tpu.memory_space<vmem>>, vector<1x1x32xf32>
    %92 = vector.shape_cast %91 : vector<1x1x32xf32> to vector<1x32xf32>
    %93 = vector.broadcast %92 : vector<1x32xf32> to vector<8x32xf32>
    %94 = arith.addf %90, %93 : vector<8x32xf32>
    %95 = arith.addf %11, %94 : vector<8x32xf32>
    %c0_41 = arith.constant 0 : index
    %c0_42 = arith.constant 0 : index
    %c0_43 = arith.constant 0 : index
    %96 = vector.load %arg10[%c0_41, %c0_42, %c0_43] : memref<2x1x32xf32, #tpu.memory_space<vmem>>, vector<1x1x32xf32>
    %97 = vector.shape_cast %96 : vector<1x1x32xf32> to vector<1x32xf32>
    %c0_44 = arith.constant 0 : index
    %c0_45 = arith.constant 0 : index
    %c0_46 = arith.constant 0 : index
    %98 = vector.load %arg11[%c0_44, %c0_45, %c0_46] : memref<2x1x32xf32, #tpu.memory_space<vmem>>, vector<1x1x32xf32>
    %99 = vector.shape_cast %98 : vector<1x1x32xf32> to vector<1x32xf32>
    %cst_47 = arith.constant dense<0.000000e+00> : vector<8xf32>
    %100 = vector.multi_reduction <add>, %95, %cst_47 [1] : vector<8x32xf32> to vector<8xf32>
    %101 = vector.shape_cast %100 : vector<8xf32> to vector<8x1xf32>
    %cst_48 = arith.constant 3.200000e+01 : f32
    %102 = vector.broadcast %cst_48 : f32 to vector<8x1xf32>
    %103 = arith.divf %101, %102 : vector<8x1xf32>
    %104 = vector.broadcast %103 : vector<8x1xf32> to vector<8x32xf32>
    %105 = arith.subf %95, %104 : vector<8x32xf32>
    %106 = arith.mulf %105, %105 : vector<8x32xf32>
    %cst_49 = arith.constant dense<0.000000e+00> : vector<8xf32>
    %107 = vector.multi_reduction <add>, %106, %cst_49 [1] : vector<8x32xf32> to vector<8xf32>
    %108 = vector.shape_cast %107 : vector<8xf32> to vector<8x1xf32>
    %cst_50 = arith.constant 3.200000e+01 : f32
    %109 = vector.broadcast %cst_50 : f32 to vector<8x1xf32>
    %110 = arith.divf %108, %109 : vector<8x1xf32>
    %111 = vector.broadcast %103 : vector<8x1xf32> to vector<8x32xf32>
    %112 = arith.subf %95, %111 : vector<8x32xf32>
    %cst_51 = arith.constant 9.99999997E-7 : f32
    %113 = vector.broadcast %cst_51 : f32 to vector<8x1xf32>
    %114 = arith.addf %110, %113 : vector<8x1xf32>
    %115 = math.rsqrt %114 : vector<8x1xf32>
    %116 = vector.broadcast %115 : vector<8x1xf32> to vector<8x32xf32>
    %117 = arith.mulf %112, %116 : vector<8x32xf32>
    %118 = vector.broadcast %97 : vector<1x32xf32> to vector<8x32xf32>
    %119 = arith.mulf %117, %118 : vector<8x32xf32>
    %120 = vector.broadcast %99 : vector<1x32xf32> to vector<8x32xf32>
    %121 = arith.addf %119, %120 : vector<8x32xf32>
    %122 = arith.truncf %121 : vector<8x32xf32> to vector<8x32xbf16>
    %c0_52 = arith.constant 0 : index
    %c0_53 = arith.constant 0 : index
    %c0_54 = arith.constant 0 : index
    %123 = vector.load %arg12[%c0_52, %c0_53, %c0_54] : memref<2x32x128xbf16, #tpu.memory_space<vmem>>, vector<1x32x128xbf16>
    %124 = vector.shape_cast %123 : vector<1x32x128xbf16> to vector<32x128xbf16>
    %cst_55 = arith.constant dense<0.000000e+00> : vector<8x128xf32>
    %125 = tpu.matmul %122, %124, %cst_55 {dimension_numbers = #tpu.dot_dimension_numbers<[1], [0], [0], [1], [0, 0, 1, 1], [], []>} : vector<8x32xbf16>, vector<32x128xbf16>, vector<8x128xf32> -> vector<8x128xf32>
    %c0_56 = arith.constant 0 : index
    %c0_57 = arith.constant 0 : index
    %c0_58 = arith.constant 0 : index
    %126 = vector.load %arg13[%c0_56, %c0_57, %c0_58] : memref<2x1x128xf32, #tpu.memory_space<vmem>>, vector<1x1x128xf32>
    %127 = vector.shape_cast %126 : vector<1x1x128xf32> to vector<1x128xf32>
    %128 = vector.broadcast %127 : vector<1x128xf32> to vector<8x128xf32>
    %129 = arith.addf %125, %128 : vector<8x128xf32>
    %130 = arith.mulf %129, %129 : vector<8x128xf32>
    %131 = arith.mulf %129, %130 : vector<8x128xf32>
    %cst_59 = arith.constant 4.471500e-02 : f32
    %132 = vector.broadcast %cst_59 : f32 to vector<8x128xf32>
    %133 = arith.mulf %132, %131 : vector<8x128xf32>
    %134 = arith.addf %129, %133 : vector<8x128xf32>
    %cst_60 = arith.constant 0.797884583 : f32
    %135 = vector.broadcast %cst_60 : f32 to vector<8x128xf32>
    %136 = arith.mulf %135, %134 : vector<8x128xf32>
    %137 = math.tanh %136 : vector<8x128xf32>
    %cst_61 = arith.constant 1.000000e+00 : f32
    %138 = vector.broadcast %cst_61 : f32 to vector<8x128xf32>
    %139 = arith.addf %138, %137 : vector<8x128xf32>
    %cst_62 = arith.constant 5.000000e-01 : f32
    %140 = vector.broadcast %cst_62 : f32 to vector<8x128xf32>
    %141 = arith.mulf %140, %139 : vector<8x128xf32>
    %142 = arith.mulf %129, %141 : vector<8x128xf32>
    %143 = arith.truncf %142 : vector<8x128xf32> to vector<8x128xbf16>
    %c0_63 = arith.constant 0 : index
    %c0_64 = arith.constant 0 : index
    %c0_65 = arith.constant 0 : index
    %144 = vector.load %arg14[%c0_63, %c0_64, %c0_65] : memref<2x128x32xbf16, #tpu.memory_space<vmem>>, vector<1x128x32xbf16>
    %145 = vector.shape_cast %144 : vector<1x128x32xbf16> to vector<128x32xbf16>
    %cst_66 = arith.constant dense<0.000000e+00> : vector<8x32xf32>
    %146 = tpu.matmul %143, %145, %cst_66 {dimension_numbers = #tpu.dot_dimension_numbers<[1], [0], [0], [1], [0, 0, 1, 1], [], []>} : vector<8x128xbf16>, vector<128x32xbf16>, vector<8x32xf32> -> vector<8x32xf32>
    %c0_67 = arith.constant 0 : index
    %c0_68 = arith.constant 0 : index
    %c0_69 = arith.constant 0 : index
    %147 = vector.load %arg15[%c0_67, %c0_68, %c0_69] : memref<2x1x32xf32, #tpu.memory_space<vmem>>, vector<1x1x32xf32>
    %148 = vector.shape_cast %147 : vector<1x1x32xf32> to vector<1x32xf32>
    %149 = vector.broadcast %148 : vector<1x32xf32> to vector<8x32xf32>
    %150 = arith.addf %146, %149 : vector<8x32xf32>
    %151 = arith.addf %95, %150 : vector<8x32xf32>
    %c1 = arith.constant 1 : index
    %c0_70 = arith.constant 0 : index
    %c0_71 = arith.constant 0 : index
    %152 = vector.load %arg4[%c1, %c0_70, %c0_71] : memref<2x1x32xf32, #tpu.memory_space<vmem>>, vector<1x1x32xf32>
    %153 = vector.shape_cast %152 : vector<1x1x32xf32> to vector<1x32xf32>
    %c1_72 = arith.constant 1 : index
    %c0_73 = arith.constant 0 : index
    %c0_74 = arith.constant 0 : index
    %154 = vector.load %arg5[%c1_72, %c0_73, %c0_74] : memref<2x1x32xf32, #tpu.memory_space<vmem>>, vector<1x1x32xf32>
    %155 = vector.shape_cast %154 : vector<1x1x32xf32> to vector<1x32xf32>
    %cst_75 = arith.constant dense<0.000000e+00> : vector<8xf32>
    %156 = vector.multi_reduction <add>, %151, %cst_75 [1] : vector<8x32xf32> to vector<8xf32>
    %157 = vector.shape_cast %156 : vector<8xf32> to vector<8x1xf32>
    %cst_76 = arith.constant 3.200000e+01 : f32
    %158 = vector.broadcast %cst_76 : f32 to vector<8x1xf32>
    %159 = arith.divf %157, %158 : vector<8x1xf32>
    %160 = vector.broadcast %159 : vector<8x1xf32> to vector<8x32xf32>
    %161 = arith.subf %151, %160 : vector<8x32xf32>
    %162 = arith.mulf %161, %161 : vector<8x32xf32>
    %cst_77 = arith.constant dense<0.000000e+00> : vector<8xf32>
    %163 = vector.multi_reduction <add>, %162, %cst_77 [1] : vector<8x32xf32> to vector<8xf32>
    %164 = vector.shape_cast %163 : vector<8xf32> to vector<8x1xf32>
    %cst_78 = arith.constant 3.200000e+01 : f32
    %165 = vector.broadcast %cst_78 : f32 to vector<8x1xf32>
    %166 = arith.divf %164, %165 : vector<8x1xf32>
    %167 = vector.broadcast %159 : vector<8x1xf32> to vector<8x32xf32>
    %168 = arith.subf %151, %167 : vector<8x32xf32>
    %cst_79 = arith.constant 9.99999997E-7 : f32
    %169 = vector.broadcast %cst_79 : f32 to vector<8x1xf32>
    %170 = arith.addf %166, %169 : vector<8x1xf32>
    %171 = math.rsqrt %170 : vector<8x1xf32>
    %172 = vector.broadcast %171 : vector<8x1xf32> to vector<8x32xf32>
    %173 = arith.mulf %168, %172 : vector<8x32xf32>
    %174 = vector.broadcast %153 : vector<1x32xf32> to vector<8x32xf32>
    %175 = arith.mulf %173, %174 : vector<8x32xf32>
    %176 = vector.broadcast %155 : vector<1x32xf32> to vector<8x32xf32>
    %177 = arith.addf %175, %176 : vector<8x32xf32>
    %178 = arith.truncf %177 : vector<8x32xf32> to vector<8x32xbf16>
    %c1_80 = arith.constant 1 : index
    %c0_81 = arith.constant 0 : index
    %c0_82 = arith.constant 0 : index
    %179 = vector.load %arg6[%c1_80, %c0_81, %c0_82] : memref<2x32x96xbf16, #tpu.memory_space<vmem>>, vector<1x32x96xbf16>
    %180 = vector.shape_cast %179 : vector<1x32x96xbf16> to vector<32x96xbf16>
    %cst_83 = arith.constant dense<0.000000e+00> : vector<8x96xf32>
    %181 = tpu.matmul %178, %180, %cst_83 {dimension_numbers = #tpu.dot_dimension_numbers<[1], [0], [0], [1], [0, 0, 1, 1], [], []>} : vector<8x32xbf16>, vector<32x96xbf16>, vector<8x96xf32> -> vector<8x96xf32>
    %c1_84 = arith.constant 1 : index
    %c0_85 = arith.constant 0 : index
    %c0_86 = arith.constant 0 : index
    %182 = vector.load %arg7[%c1_84, %c0_85, %c0_86] : memref<2x1x96xf32, #tpu.memory_space<vmem>>, vector<1x1x96xf32>
    %183 = vector.shape_cast %182 : vector<1x1x96xf32> to vector<1x96xf32>
    %184 = vector.broadcast %183 : vector<1x96xf32> to vector<8x96xf32>
    %185 = arith.addf %181, %184 : vector<8x96xf32>
    %186 = vector.extract_strided_slice %185 {offsets = [0, 0], sizes = [8, 16], strides = [1, 1]} : vector<8x96xf32> to vector<8x16xf32>
    %187 = vector.extract_strided_slice %185 {offsets = [0, 32], sizes = [8, 16], strides = [1, 1]} : vector<8x96xf32> to vector<8x16xf32>
    %188 = vector.extract_strided_slice %185 {offsets = [0, 64], sizes = [8, 16], strides = [1, 1]} : vector<8x96xf32> to vector<8x16xf32>
    %189 = arith.truncf %186 : vector<8x16xf32> to vector<8x16xbf16>
    %190 = arith.truncf %187 : vector<8x16xf32> to vector<8x16xbf16>
    %cst_87 = arith.constant dense<0.000000e+00> : vector<8x8xf32>
    %191 = tpu.matmul %189, %190, %cst_87 {dimension_numbers = #tpu.dot_dimension_numbers<[1], [1], [0], [0], [0, 0, 1, 0], [], []>} : vector<8x16xbf16>, vector<8x16xbf16>, vector<8x8xf32> -> vector<8x8xf32>
    %192 = arith.addf %191, %5 : vector<8x8xf32>
    %cst_88 = arith.constant dense<0xFF800000> : vector<8xf32>
    %193 = vector.multi_reduction <maximumf>, %192, %cst_88 [1] : vector<8x8xf32> to vector<8xf32>
    %194 = vector.shape_cast %193 : vector<8xf32> to vector<8x1xf32>
    %195 = vector.broadcast %194 : vector<8x1xf32> to vector<8x8xf32>
    %196 = arith.subf %192, %195 : vector<8x8xf32>
    %197 = math.exp %196 : vector<8x8xf32>
    %cst_89 = arith.constant dense<0.000000e+00> : vector<8xf32>
    %198 = vector.multi_reduction <add>, %197, %cst_89 [1] : vector<8x8xf32> to vector<8xf32>
    %199 = vector.shape_cast %198 : vector<8xf32> to vector<8x1xf32>
    %200 = tpu.reciprocal %199 {approx = true} : vector<8x1xf32> -> vector<8x1xf32>
    %201 = vector.broadcast %200 : vector<8x1xf32> to vector<8x8xf32>
    %202 = arith.mulf %197, %201 : vector<8x8xf32>
    %203 = arith.truncf %202 : vector<8x8xf32> to vector<8x8xbf16>
    %204 = arith.truncf %188 : vector<8x16xf32> to vector<8x16xbf16>
    %cst_90 = arith.constant dense<0.000000e+00> : vector<8x16xf32>
    %205 = tpu.matmul %203, %204, %cst_90 {dimension_numbers = #tpu.dot_dimension_numbers<[1], [0], [0], [1], [0, 0, 1, 1], [], []>} : vector<8x8xbf16>, vector<8x16xbf16>, vector<8x16xf32> -> vector<8x16xf32>
    %206 = vector.extract_strided_slice %185 {offsets = [0, 16], sizes = [8, 16], strides = [1, 1]} : vector<8x96xf32> to vector<8x16xf32>
    %207 = vector.extract_strided_slice %185 {offsets = [0, 48], sizes = [8, 16], strides = [1, 1]} : vector<8x96xf32> to vector<8x16xf32>
    %208 = vector.extract_strided_slice %185 {offsets = [0, 80], sizes = [8, 16], strides = [1, 1]} : vector<8x96xf32> to vector<8x16xf32>
    %209 = arith.truncf %206 : vector<8x16xf32> to vector<8x16xbf16>
    %210 = arith.truncf %207 : vector<8x16xf32> to vector<8x16xbf16>
    %cst_91 = arith.constant dense<0.000000e+00> : vector<8x8xf32>
    %211 = tpu.matmul %209, %210, %cst_91 {dimension_numbers = #tpu.dot_dimension_numbers<[1], [1], [0], [0], [0, 0, 1, 0], [], []>} : vector<8x16xbf16>, vector<8x16xbf16>, vector<8x8xf32> -> vector<8x8xf32>
    %212 = arith.addf %211, %5 : vector<8x8xf32>
    %cst_92 = arith.constant dense<0xFF800000> : vector<8xf32>
    %213 = vector.multi_reduction <maximumf>, %212, %cst_92 [1] : vector<8x8xf32> to vector<8xf32>
    %214 = vector.shape_cast %213 : vector<8xf32> to vector<8x1xf32>
    %215 = vector.broadcast %214 : vector<8x1xf32> to vector<8x8xf32>
    %216 = arith.subf %212, %215 : vector<8x8xf32>
    %217 = math.exp %216 : vector<8x8xf32>
    %cst_93 = arith.constant dense<0.000000e+00> : vector<8xf32>
    %218 = vector.multi_reduction <add>, %217, %cst_93 [1] : vector<8x8xf32> to vector<8xf32>
    %219 = vector.shape_cast %218 : vector<8xf32> to vector<8x1xf32>
    %220 = tpu.reciprocal %219 {approx = true} : vector<8x1xf32> -> vector<8x1xf32>
    %221 = vector.broadcast %220 : vector<8x1xf32> to vector<8x8xf32>
    %222 = arith.mulf %217, %221 : vector<8x8xf32>
    %223 = arith.truncf %222 : vector<8x8xf32> to vector<8x8xbf16>
    %224 = arith.truncf %208 : vector<8x16xf32> to vector<8x16xbf16>
    %cst_94 = arith.constant dense<0.000000e+00> : vector<8x16xf32>
    %225 = tpu.matmul %223, %224, %cst_94 {dimension_numbers = #tpu.dot_dimension_numbers<[1], [0], [0], [1], [0, 0, 1, 1], [], []>} : vector<8x8xbf16>, vector<8x16xbf16>, vector<8x16xf32> -> vector<8x16xf32>
    %226 = tpu.concatenate %205, %225 in 1 : vector<8x16xf32>, vector<8x16xf32> -> vector<8x32xf32>
    %227 = arith.truncf %226 : vector<8x32xf32> to vector<8x32xbf16>
    %c1_95 = arith.constant 1 : index
    %c0_96 = arith.constant 0 : index
    %c0_97 = arith.constant 0 : index
    %228 = vector.load %arg8[%c1_95, %c0_96, %c0_97] : memref<2x32x32xbf16, #tpu.memory_space<vmem>>, vector<1x32x32xbf16>
    %229 = vector.shape_cast %228 : vector<1x32x32xbf16> to vector<32x32xbf16>
    %cst_98 = arith.constant dense<0.000000e+00> : vector<8x32xf32>
    %230 = tpu.matmul %227, %229, %cst_98 {dimension_numbers = #tpu.dot_dimension_numbers<[1], [0], [0], [1], [0, 0, 1, 1], [], []>} : vector<8x32xbf16>, vector<32x32xbf16>, vector<8x32xf32> -> vector<8x32xf32>
    %c1_99 = arith.constant 1 : index
    %c0_100 = arith.constant 0 : index
    %c0_101 = arith.constant 0 : index
    %231 = vector.load %arg9[%c1_99, %c0_100, %c0_101] : memref<2x1x32xf32, #tpu.memory_space<vmem>>, vector<1x1x32xf32>
    %232 = vector.shape_cast %231 : vector<1x1x32xf32> to vector<1x32xf32>
    %233 = vector.broadcast %232 : vector<1x32xf32> to vector<8x32xf32>
    %234 = arith.addf %230, %233 : vector<8x32xf32>
    %235 = arith.addf %151, %234 : vector<8x32xf32>
    %c1_102 = arith.constant 1 : index
    %c0_103 = arith.constant 0 : index
    %c0_104 = arith.constant 0 : index
    %236 = vector.load %arg10[%c1_102, %c0_103, %c0_104] : memref<2x1x32xf32, #tpu.memory_space<vmem>>, vector<1x1x32xf32>
    %237 = vector.shape_cast %236 : vector<1x1x32xf32> to vector<1x32xf32>
    %c1_105 = arith.constant 1 : index
    %c0_106 = arith.constant 0 : index
    %c0_107 = arith.constant 0 : index
    %238 = vector.load %arg11[%c1_105, %c0_106, %c0_107] : memref<2x1x32xf32, #tpu.memory_space<vmem>>, vector<1x1x32xf32>
    %239 = vector.shape_cast %238 : vector<1x1x32xf32> to vector<1x32xf32>
    %cst_108 = arith.constant dense<0.000000e+00> : vector<8xf32>
    %240 = vector.multi_reduction <add>, %235, %cst_108 [1] : vector<8x32xf32> to vector<8xf32>
    %241 = vector.shape_cast %240 : vector<8xf32> to vector<8x1xf32>
    %cst_109 = arith.constant 3.200000e+01 : f32
    %242 = vector.broadcast %cst_109 : f32 to vector<8x1xf32>
    %243 = arith.divf %241, %242 : vector<8x1xf32>
    %244 = vector.broadcast %243 : vector<8x1xf32> to vector<8x32xf32>
    %245 = arith.subf %235, %244 : vector<8x32xf32>
    %246 = arith.mulf %245, %245 : vector<8x32xf32>
    %cst_110 = arith.constant dense<0.000000e+00> : vector<8xf32>
    %247 = vector.multi_reduction <add>, %246, %cst_110 [1] : vector<8x32xf32> to vector<8xf32>
    %248 = vector.shape_cast %247 : vector<8xf32> to vector<8x1xf32>
    %cst_111 = arith.constant 3.200000e+01 : f32
    %249 = vector.broadcast %cst_111 : f32 to vector<8x1xf32>
    %250 = arith.divf %248, %249 : vector<8x1xf32>
    %251 = vector.broadcast %243 : vector<8x1xf32> to vector<8x32xf32>
    %252 = arith.subf %235, %251 : vector<8x32xf32>
    %cst_112 = arith.constant 9.99999997E-7 : f32
    %253 = vector.broadcast %cst_112 : f32 to vector<8x1xf32>
    %254 = arith.addf %250, %253 : vector<8x1xf32>
    %255 = math.rsqrt %254 : vector<8x1xf32>
    %256 = vector.broadcast %255 : vector<8x1xf32> to vector<8x32xf32>
    %257 = arith.mulf %252, %256 : vector<8x32xf32>
    %258 = vector.broadcast %237 : vector<1x32xf32> to vector<8x32xf32>
    %259 = arith.mulf %257, %258 : vector<8x32xf32>
    %260 = vector.broadcast %239 : vector<1x32xf32> to vector<8x32xf32>
    %261 = arith.addf %259, %260 : vector<8x32xf32>
    %262 = arith.truncf %261 : vector<8x32xf32> to vector<8x32xbf16>
    %c1_113 = arith.constant 1 : index
    %c0_114 = arith.constant 0 : index
    %c0_115 = arith.constant 0 : index
    %263 = vector.load %arg12[%c1_113, %c0_114, %c0_115] : memref<2x32x128xbf16, #tpu.memory_space<vmem>>, vector<1x32x128xbf16>
    %264 = vector.shape_cast %263 : vector<1x32x128xbf16> to vector<32x128xbf16>
    %cst_116 = arith.constant dense<0.000000e+00> : vector<8x128xf32>
    %265 = tpu.matmul %262, %264, %cst_116 {dimension_numbers = #tpu.dot_dimension_numbers<[1], [0], [0], [1], [0, 0, 1, 1], [], []>} : vector<8x32xbf16>, vector<32x128xbf16>, vector<8x128xf32> -> vector<8x128xf32>
    %c1_117 = arith.constant 1 : index
    %c0_118 = arith.constant 0 : index
    %c0_119 = arith.constant 0 : index
    %266 = vector.load %arg13[%c1_117, %c0_118, %c0_119] : memref<2x1x128xf32, #tpu.memory_space<vmem>>, vector<1x1x128xf32>
    %267 = vector.shape_cast %266 : vector<1x1x128xf32> to vector<1x128xf32>
    %268 = vector.broadcast %267 : vector<1x128xf32> to vector<8x128xf32>
    %269 = arith.addf %265, %268 : vector<8x128xf32>
    %270 = arith.mulf %269, %269 : vector<8x128xf32>
    %271 = arith.mulf %269, %270 : vector<8x128xf32>
    %cst_120 = arith.constant 4.471500e-02 : f32
    %272 = vector.broadcast %cst_120 : f32 to vector<8x128xf32>
    %273 = arith.mulf %272, %271 : vector<8x128xf32>
    %274 = arith.addf %269, %273 : vector<8x128xf32>
    %cst_121 = arith.constant 0.797884583 : f32
    %275 = vector.broadcast %cst_121 : f32 to vector<8x128xf32>
    %276 = arith.mulf %275, %274 : vector<8x128xf32>
    %277 = math.tanh %276 : vector<8x128xf32>
    %cst_122 = arith.constant 1.000000e+00 : f32
    %278 = vector.broadcast %cst_122 : f32 to vector<8x128xf32>
    %279 = arith.addf %278, %277 : vector<8x128xf32>
    %cst_123 = arith.constant 5.000000e-01 : f32
    %280 = vector.broadcast %cst_123 : f32 to vector<8x128xf32>
    %281 = arith.mulf %280, %279 : vector<8x128xf32>
    %282 = arith.mulf %269, %281 : vector<8x128xf32>
    %283 = arith.truncf %282 : vector<8x128xf32> to vector<8x128xbf16>
    %c1_124 = arith.constant 1 : index
    %c0_125 = arith.constant 0 : index
    %c0_126 = arith.constant 0 : index
    %284 = vector.load %arg14[%c1_124, %c0_125, %c0_126] : memref<2x128x32xbf16, #tpu.memory_space<vmem>>, vector<1x128x32xbf16>
    %285 = vector.shape_cast %284 : vector<1x128x32xbf16> to vector<128x32xbf16>
    %cst_127 = arith.constant dense<0.000000e+00> : vector<8x32xf32>
    %286 = tpu.matmul %283, %285, %cst_127 {dimension_numbers = #tpu.dot_dimension_numbers<[1], [0], [0], [1], [0, 0, 1, 1], [], []>} : vector<8x128xbf16>, vector<128x32xbf16>, vector<8x32xf32> -> vector<8x32xf32>
    %c1_128 = arith.constant 1 : index
    %c0_129 = arith.constant 0 : index
    %c0_130 = arith.constant 0 : index
    %287 = vector.load %arg15[%c1_128, %c0_129, %c0_130] : memref<2x1x32xf32, #tpu.memory_space<vmem>>, vector<1x1x32xf32>
    %288 = vector.shape_cast %287 : vector<1x1x32xf32> to vector<1x32xf32>
    %289 = vector.broadcast %288 : vector<1x32xf32> to vector<8x32xf32>
    %290 = arith.addf %286, %289 : vector<8x32xf32>
    %291 = arith.addf %235, %290 : vector<8x32xf32>
    %c0_131 = arith.constant 0 : index
    %c0_132 = arith.constant 0 : index
    %292 = vector.load %arg16[%c0_131, %c0_132] : memref<1x32xf32, #tpu.memory_space<vmem>>, vector<1x32xf32>
    %c0_133 = arith.constant 0 : index
    %c0_134 = arith.constant 0 : index
    %293 = vector.load %arg17[%c0_133, %c0_134] : memref<1x32xf32, #tpu.memory_space<vmem>>, vector<1x32xf32>
    %cst_135 = arith.constant dense<0.000000e+00> : vector<8xf32>
    %294 = vector.multi_reduction <add>, %291, %cst_135 [1] : vector<8x32xf32> to vector<8xf32>
    %295 = vector.shape_cast %294 : vector<8xf32> to vector<8x1xf32>
    %cst_136 = arith.constant 3.200000e+01 : f32
    %296 = vector.broadcast %cst_136 : f32 to vector<8x1xf32>
    %297 = arith.divf %295, %296 : vector<8x1xf32>
    %298 = vector.broadcast %297 : vector<8x1xf32> to vector<8x32xf32>
    %299 = arith.subf %291, %298 : vector<8x32xf32>
    %300 = arith.mulf %299, %299 : vector<8x32xf32>
    %cst_137 = arith.constant dense<0.000000e+00> : vector<8xf32>
    %301 = vector.multi_reduction <add>, %300, %cst_137 [1] : vector<8x32xf32> to vector<8xf32>
    %302 = vector.shape_cast %301 : vector<8xf32> to vector<8x1xf32>
    %cst_138 = arith.constant 3.200000e+01 : f32
    %303 = vector.broadcast %cst_138 : f32 to vector<8x1xf32>
    %304 = arith.divf %302, %303 : vector<8x1xf32>
    %305 = vector.broadcast %297 : vector<8x1xf32> to vector<8x32xf32>
    %306 = arith.subf %291, %305 : vector<8x32xf32>
    %cst_139 = arith.constant 9.99999997E-7 : f32
    %307 = vector.broadcast %cst_139 : f32 to vector<8x1xf32>
    %308 = arith.addf %304, %307 : vector<8x1xf32>
    %309 = math.rsqrt %308 : vector<8x1xf32>
    %310 = vector.broadcast %309 : vector<8x1xf32> to vector<8x32xf32>
    %311 = arith.mulf %306, %310 : vector<8x32xf32>
    %312 = vector.broadcast %292 : vector<1x32xf32> to vector<8x32xf32>
    %313 = arith.mulf %311, %312 : vector<8x32xf32>
    %314 = vector.broadcast %293 : vector<1x32xf32> to vector<8x32xf32>
    %315 = arith.addf %313, %314 : vector<8x32xf32>
    %316 = arith.truncf %315 : vector<8x32xf32> to vector<8x32xbf16>
    %c0_140 = arith.constant 0 : index
    %c0_141 = arith.constant 0 : index
    %317 = vector.load %arg18[%c0_140, %c0_141] : memref<32x128xbf16, #tpu.memory_space<vmem>>, vector<32x128xbf16>
    %cst_142 = arith.constant dense<0.000000e+00> : vector<8x128xf32>
    %318 = tpu.matmul %316, %317, %cst_142 {dimension_numbers = #tpu.dot_dimension_numbers<[1], [0], [0], [1], [0, 0, 1, 1], [], []>} : vector<8x32xbf16>, vector<32x128xbf16>, vector<8x128xf32> -> vector<8x128xf32>
    %c0_143 = arith.constant 0 : index
    %c0_144 = arith.constant 0 : index
    %319 = vector.load %arg19[%c0_143, %c0_144] : memref<1x128xf32, #tpu.memory_space<vmem>>, vector<1x128xf32>
    %320 = vector.broadcast %319 : vector<1x128xf32> to vector<8x128xf32>
    %321 = arith.addf %318, %320 : vector<8x128xf32>
    %c0_145 = arith.constant 0 : index
    %c0_146 = arith.constant 0 : index
    %322 = vector.load %arg20[%c0_145, %c0_146] : memref<8x128xf32, #tpu.memory_space<vmem>>, vector<8x128xf32>
    tpu.vector_store %arg20[%c0_145, %c0_146], %321 {strides = array<i32>} : memref<8x128xf32, #tpu.memory_space<vmem>>, vector<8x128xf32>,
    return
  }
  func.func @transform_0(%arg0: i32) -> (i32, i32, i32) {
    %c0_i32 = arith.constant 0 : i32
    %c0_i32_0 = arith.constant 0 : i32
    %c0_i32_1 = arith.constant 0 : i32
    return %arg0, %c0_i32, %c0_i32_0 : i32, i32, i32
  }
  func.func @transform_1(%arg0: i32) -> (i32, i32) {
    %c0_i32 = arith.constant 0 : i32
    %c0_i32_0 = arith.constant 0 : i32
    %c0_i32_1 = arith.constant 0 : i32
    return %c0_i32, %c0_i32_0 : i32, i32
  }
  func.func @transform_2(%arg0: i32) -> (i32, i32) {
    %c0_i32 = arith.constant 0 : i32
    %c0_i32_0 = arith.constant 0 : i32
    %c0_i32_1 = arith.constant 0 : i32
    return %c0_i32, %c0_i32_0 : i32, i32
  }
  func.func @transform_3(%arg0: i32) -> (i32, i32, i32) {
    %c0_i32 = arith.constant 0 : i32
    %c0_i32_0 = arith.constant 0 : i32
    %c0_i32_1 = arith.constant 0 : i32
    %c0_i32_2 = arith.constant 0 : i32
    return %c0_i32, %c0_i32_0, %c0_i32_1 : i32, i32, i32
  }
  func.func @transform_4(%arg0: i32) -> (i32, i32, i32) {
    %c0_i32 = arith.constant 0 : i32
    %c0_i32_0 = arith.constant 0 : i32
    %c0_i32_1 = arith.constant 0 : i32
    %c0_i32_2 = arith.constant 0 : i32
    return %c0_i32, %c0_i32_0, %c0_i32_1 : i32, i32, i32
  }
  func.func @transform_5(%arg0: i32) -> (i32, i32, i32) {
    %c0_i32 = arith.constant 0 : i32
    %c0_i32_0 = arith.constant 0 : i32
    %c0_i32_1 = arith.constant 0 : i32
    %c0_i32_2 = arith.constant 0 : i32
    return %c0_i32, %c0_i32_0, %c0_i32_1 : i32, i32, i32
  }
  func.func @transform_6(%arg0: i32) -> (i32, i32, i32) {
    %c0_i32 = arith.constant 0 : i32
    %c0_i32_0 = arith.constant 0 : i32
    %c0_i32_1 = arith.constant 0 : i32
    %c0_i32_2 = arith.constant 0 : i32
    return %c0_i32, %c0_i32_0, %c0_i32_1 : i32, i32, i32
  }
  func.func @transform_7(%arg0: i32) -> (i32, i32, i32) {
    %c0_i32 = arith.constant 0 : i32
    %c0_i32_0 = arith.constant 0 : i32
    %c0_i32_1 = arith.constant 0 : i32
    %c0_i32_2 = arith.constant 0 : i32
    return %c0_i32, %c0_i32_0, %c0_i32_1 : i32, i32, i32
  }
  func.func @transform_8(%arg0: i32) -> (i32, i32, i32) {
    %c0_i32 = arith.constant 0 : i32
    %c0_i32_0 = arith.constant 0 : i32
    %c0_i32_1 = arith.constant 0 : i32
    %c0_i32_2 = arith.constant 0 : i32
    return %c0_i32, %c0_i32_0, %c0_i32_1 : i32, i32, i32
  }
  func.func @transform_9(%arg0: i32) -> (i32, i32, i32) {
    %c0_i32 = arith.constant 0 : i32
    %c0_i32_0 = arith.constant 0 : i32
    %c0_i32_1 = arith.constant 0 : i32
    %c0_i32_2 = arith.constant 0 : i32
    return %c0_i32, %c0_i32_0, %c0_i32_1 : i32, i32, i32
  }
  func.func @transform_10(%arg0: i32) -> (i32, i32, i32) {
    %c0_i32 = arith.constant 0 : i32
    %c0_i32_0 = arith.constant 0 : i32
    %c0_i32_1 = arith.constant 0 : i32
    %c0_i32_2 = arith.constant 0 : i32
    return %c0_i32, %c0_i32_0, %c0_i32_1 : i32, i32, i32
  }
  func.func @transform_11(%arg0: i32) -> (i32, i32, i32) {
    %c0_i32 = arith.constant 0 : i32
    %c0_i32_0 = arith.constant 0 : i32
    %c0_i32_1 = arith.constant 0 : i32
    %c0_i32_2 = arith.constant 0 : i32
    return %c0_i32, %c0_i32_0, %c0_i32_1 : i32, i32, i32
  }
  func.func @transform_12(%arg0: i32) -> (i32, i32, i32) {
    %c0_i32 = arith.constant 0 : i32
    %c0_i32_0 = arith.constant 0 : i32
    %c0_i32_1 = arith.constant 0 : i32
    %c0_i32_2 = arith.constant 0 : i32
    return %c0_i32, %c0_i32_0, %c0_i32_1 : i32, i32, i32
  }
  func.func @transform_13(%arg0: i32) -> (i32, i32, i32) {
    %c0_i32 = arith.constant 0 : i32
    %c0_i32_0 = arith.constant 0 : i32
    %c0_i32_1 = arith.constant 0 : i32
    %c0_i32_2 = arith.constant 0 : i32
    return %c0_i32, %c0_i32_0, %c0_i32_1 : i32, i32, i32
  }
  func.func @transform_14(%arg0: i32) -> (i32, i32, i32) {
    %c0_i32 = arith.constant 0 : i32
    %c0_i32_0 = arith.constant 0 : i32
    %c0_i32_1 = arith.constant 0 : i32
    %c0_i32_2 = arith.constant 0 : i32
    return %c0_i32, %c0_i32_0, %c0_i32_1 : i32, i32, i32
  }
  func.func @transform_15(%arg0: i32) -> (i32, i32) {
    %c0_i32 = arith.constant 0 : i32
    %c0_i32_0 = arith.constant 0 : i32
    %c0_i32_1 = arith.constant 0 : i32
    return %c0_i32, %c0_i32_0 : i32, i32
  }
  func.func @transform_16(%arg0: i32) -> (i32, i32) {
    %c0_i32 = arith.constant 0 : i32
    %c0_i32_0 = arith.constant 0 : i32
    %c0_i32_1 = arith.constant 0 : i32
    return %c0_i32, %c0_i32_0 : i32, i32
  }
  func.func @transform_17(%arg0: i32) -> (i32, i32) {
    %c0_i32 = arith.constant 0 : i32
    %c0_i32_0 = arith.constant 0 : i32
    %c0_i32_1 = arith.constant 0 : i32
    return %c0_i32, %c0_i32_0 : i32, i32
  }
  func.func @transform_18(%arg0: i32) -> (i32, i32) {
    %c0_i32 = arith.constant 0 : i32
    %c0_i32_0 = arith.constant 0 : i32
    %c0_i32_1 = arith.constant 0 : i32
    return %c0_i32, %c0_i32_0 : i32, i32
  }
  func.func @transform_19(%arg0: i32) -> (i32, i32) {
    %c0_i32 = arith.constant 0 : i32
    %c0_i32_0 = arith.constant 0 : i32
    return %arg0, %c0_i32 : i32, i32
  }
}

</mosaic_0001>

<bundles_post_ra>
// kernel: tpu_custom_call.1
= control target key start
LH: loop header
LB: loop body
LE: loop exit
PB: predicated region body
PF: predicated region fallthrough
CT: control target
= control target key end

     0   :  { %s3226_s0 = inlined_call_operand.vmem [shape: bf16[2,8,192], index: 0, kind: input, shape index: {}]   ;;  %s3227_s1 = inlined_call_operand.vmem [shape: bf16[192,32], index: 1, kind: input, shape index: {}]   ;;  %s3228_s2 = inlined_call_operand.vmem [shape: f32[8,32], index: 2, kind: input, shape index: {}]   ;;  %s3229_s3 = inlined_call_operand.vmem [shape: f32[2,1,32], index: 3, kind: input, shape index: {}]   ;;  %s3230_s4 = inlined_call_operand.vmem [shape: f32[2,1,32], index: 4, kind: input, shape index: {}]   ;;  %s3231_s5 = inlined_call_operand.vmem [shape: bf16[2,32,96], index: 5, kind: input, shape index: {}]   ;;  %s3232_s6 = inlined_call_operand.vmem [shape: f32[2,1,96], index: 6, kind: input, shape index: {}]   ;;  %s3233_s7 = inlined_call_operand.vmem [shape: bf16[2,32,32], index: 7, kind: input, shape index: {}]   ;;  %s3234_s8 = inlined_call_operand.vmem [shape: f32[2,1,32], index: 8, kind: input, shape index: {}]   ;;  %s3235_s9 = inlined_call_operand.vmem [shape: f32[2,1,32], index: 9, kind: input, shape index: {}]   ;;  %s3236_s10 = inlined_call_operand.vmem [shape: f32[2,1,32], index: 10, kind: input, shape index: {}]   ;;  %s3237_s11 = inlined_call_operand.vmem [shape: bf16[2,32,128], index: 11, kind: input, shape index: {}]   ;;  %s3238_s12 = inlined_call_operand.vmem [shape: f32[2,1,128], index: 12, kind: input, shape index: {}]   ;;  %s3239_s13 = inlined_call_operand.vmem [shape: bf16[2,128,32], index: 13, kind: input, shape index: {}]   ;;  %s3240_s14 = inlined_call_operand.vmem [shape: f32[2,1,32], index: 14, kind: input, shape index: {}]   ;;  %s3241_s15 = inlined_call_operand.vmem [shape: f32[1,32], index: 15, kind: input, shape index: {}]   ;;  %s3242_s16 = inlined_call_operand.vmem [shape: f32[1,32], index: 16, kind: input, shape index: {}]   ;;  %s3243_s17 = inlined_call_operand.vmem [shape: bf16[32,128], index: 17, kind: input, shape index: {}]   ;;  %s3244_s18 = inlined_call_operand.vmem [shape: f32[1,128], index: 18, kind: input, shape index: {}]   ;;  %s3245_s19 = inlined_call_operand.hbm [shape: f32[16,128], index: 19, kind: output, shape index: {}]  }
   0x1   :  { %3258 = sst [smem:[#allocation11_spill]] %s3226_s0 }
   0x2   :  { %3259 = sst [smem:[#allocation12_spill]] %s3227_s1 }
   0x3   :  { %3260 = sst [smem:[#allocation13_spill]] %s3228_s2 }
   0x4   :  { %3261 = sst [smem:[#allocation14_spill]] %s3229_s3 }
   0x5   :  { %3262 = sst [smem:[#allocation15_spill]] %s3230_s4 }
   0x6   :  { %3263 = sst [smem:[#allocation16_spill]] %s3245_s19 }
   0x7   :  { %24 = vsyncpa [#allocation3], 0 }
   0x8   :  { %26 = vsyncpa [#allocation3 + $0x1], 0  ;;  %s2779_s0 = smov 0   ;;  %s2781_s30 = smov 0  }
   0x9   :  { %s2783_s20 = smov 0   ;;  %s2785_s21 = smov 0  }
   0xa LB: > { %3264 = sst [smem:[#allocation5_spill]] %s2654_s0  ;;  %s2800_s1 = sadd.s32 4294967295, %s2666_s21   ;;  %s2666_s21 = sphi %s2785_s21, %s3285_s21   ;;  %s2662_s20 = sphi %s2783_s20, %s3287_s20   ;;  %s2658_s30 = sphi %s2781_s30, %s3289_s30   ;;  %s2654_s0 = sphi %s2779_s0, %s3288_s0  }
   0xb   : > { %3265 = sst [smem:[#allocation6_spill]] %s2662_s20  ;;  %s2155_s22 = sadd.s32 4294967294, %s2666_s21  }
   0xc   : > { %3266 = sst [smem:[#allocation7_spill]] %s2666_s21  ;;  %s2804_s2 = sadd.s32 1, %s2666_s21  }
   0xd   : > { %3267 = sst [smem:[#allocation8_spill]] %s2804_s2  ;;  %s443_s23 = sadd.s32 1, %s2662_s20 }
   0xe   : > { %s440_s24 = ssub.s32 %s2666_s21, %s2804_s2  ;;  %p453_p0 = scmp.ne.s32.totalorder %s2662_s20, %s2658_s30 }
   0xf   : > { %p441_p1 = scmp.eq.s32.totalorder %s440_s24, 0  ;;  %p454_p2 = scmp.eq.s32.totalorder %s2800_s1, 1 }
  0x10   : > { %p459_p3 = scmp.ne.s32.totalorder %s2658_s30, %s2654_s0  ;;  %p460_p4 = scmp.eq.s32.totalorder %s2155_s22, 1 }
  0x11   : > { %s2815_s25 = scalar_select %p441_p1, %s2662_s20, %s443_s23  }
  0x12   : > { %p2817_p5 = por %p454_p2, %p453_p0  ;;  %p2821_p6 = por %p460_p4, %p459_p3 }
  0x13   : > { %3268 = sst [smem:[#allocation9_spill]] %s2815_s25  ;;  %p2158_p7 = scmp.ge.s32.totalorder %s2666_s21, 1 }
  0x14   : > { %s3270_s26 = scalar_select %p2821_p6, 1, 0 }
  0x15   : > { %p540_p8 = scmp.lt.s32.totalorder %s2666_s21, 3 }
  0x16   : > { %3271 = sst [smem:[#allocation10_spill]] %s3270_s26 }
  0x17   : > { %p541_p9 = pnand %p2158_p7, %p540_p8 }
  0x18   : > { %s3272_s29 = sld [smem:[#allocation12_spill]] (!%p541_p9)  ;;  %v2668_v1 = vmov (!%p541_p9), 0   ;;  %p596_p10 = scmp.lt.s32.totalorder (!%p541_p9), %s2800_s1, 1  ;;  %vm710_vm0 = vcmask (!%p541_p9), 523264   ;;  %vm756_vm1 = vcmask (!%p541_p9), 261120   ;;  %v2544_v28 = vld [vmem:[%s3231_s5] sm:$0xff] (!%p541_p9)   ;;  %v602_v52 = vlaneseq (!%p541_p9) }
  0x19   : > { %544 = sbr.rel (%p541_p9) target bundleno = 6919 (0x1b07), region = 96  ;;  %714 = vmatprep.subr.bf16.mxu0 (!%p541_p9), %v2668_v1  ;;  %s3273_s26 = sld [smem:[#allocation11_spill]] (!%p541_p9)  ;;  %v2669_v29 = vmov (!%p541_p9), 0.0   ;;  %vm2670_vm2 = vmmov (!%p541_p9), 0   ;;  %v2545_v30 = vld [vmem:[%s3231_s5 + $0x8] sm:$0xff] (!%p541_p9)   ;;  %vm856_vm3 = vcmask (!%p541_p9), 130048  }
  0x1a   : > { %s3274_s21 = sld [smem:[#allocation13_spill]] (!%p541_p9)  ;;  %2337 = vmatprep.subr.bf16.mxu1 (!%p541_p9), %v2669_v29  ;;  %2341 = vmatprep.mubr.msk.bf16.mxu1 (!%p541_p9), %vm2670_vm2, %v2669_v29  ;;  %s3275_s23 = sld [smem:[#allocation14_spill]] (!%p541_p9)  ;;  %v2179_v41 = vld [vmem:[%s3232_s6] ss:$0 sm:$0xff] (!%p541_p9)  ;;  %vm921_vm4 = vcmask (!%p541_p9), 1043456   ;;  %v603_v53 = vand.u32 (!%p541_p9), 127, %v602_v52 }
  0x1b   : > { %2338 = vmatpush3.bf16.msra.mxu1 (!%p541_p9), %v2544_v28  ;;  %s3276_s4 = sld [smem:[#allocation15_spill]] (!%p541_p9)  ;;  %v2673_v54 = vmov (!%p541_p9), -1e+30   ;;  %vm903_vm6 = vcmask (!%p541_p9), 64512   ;;  %s3256_s27 = smov (!%p541_p9), 48  }
  0x1c   : > { %2339 = vmatprep.subr.bf16.mxu1 (!%p541_p9), %v2669_v29  ;;  %vm604_vm5 = vcmp.lt.s32.totalorder (!%p541_p9), %v603_v53, 5  ;;  %s3279_s19 = smov (!%p541_p9), 16   ;;  %s2278_s25 = sshll.u32 (!%p541_p9), %s2800_s1, 7 }
  0x1d   : > { %v2917_v55 = vsel (!%p541_p9), %vm604_vm5, 0.0, %v2673_v54  ;;  %s3280_s20 = sld [smem:[#allocation16_spill]] (!%p541_p9) }
  0x1e   : > { %v2530_v0 = vld [vmem:[%s3272_s29] sm:$0xff] (!%p541_p9)   ;;  %v2531_v2 = vld [vmem:[%s3272_s29 + $0x8] sm:$0xff] (!%p541_p9)   ;;  %v2532_v3 = vld [vmem:[%s3272_s29 + $0x10] sm:$0xff] (!%p541_p9)  }
  0x1f   : > { %715 = vmatpush1.bf16.msra.mxu0 (!%p541_p9), %v2530_v0  ;;  %v2533_v4 = vld [vmem:[%s3272_s29 + $0x18] sm:$0xff] (!%p541_p9)   ;;  %v2534_v5 = vld [vmem:[%s3272_s29 + $0x20] sm:$0xff] (!%p541_p9)   ;;  %v2535_v8 = vld [vmem:[%s3272_s29 + $0x28] sm:$0xff] (!%p541_p9)   ;;  %2340 = vmatpush3.bf16.msra.mxu1 (!%p541_p9), %v2545_v30 }
  0x20   : > { %716 = vmatprep.subr.bf16.mxu0 %v2668_v1  ;;  %s597_s24 = scalar_select %p596_p10, %s2800_s1, 1  ;;  %v2536_v9 = vld [vmem:[%s3272_s29 + $0x30] sm:$0xff]   ;;  %v2537_v10 = vld [vmem:[%s3272_s29 + $0x38] sm:$0xff]   ;;  %v2538_v11 = vld [vmem:[%s3272_s29 + $0x40] sm:$0xff]   ;;  %2345 = vmatprep.subr.bf16.mxu1 %v2669_v29 }
  0x21   : > { %v2539_v12 = vld [vmem:[%s3272_s29 + $0x48] sm:$0xff]   ;;  %v2540_v13 = vld [vmem:[%s3272_s29 + $0x50] sm:$0xff]   ;;  %v2541_v14 = vld [vmem:[%s3272_s29 + $0x58] sm:$0xff]  }
  0x22   : > { %s2281_s2 = sshll.u32 %s597_s24, 3  ;;  %v631_v16 = vld [vmem:[%s3274_s21] sm:$0xff]  ;;  %s2671_s21 = smov 64  }
  0x23   : > { %717 = vmatpush1.bf16.msra.mxu0 %v2531_v2  ;;  %s600_s0 = scalar_lea.vmem %s3273_s26, %s2281_s2  ;;  %v2177_v35 = vld [vmem:[%s3275_s23] ss:$0 sm:$0xff]  ;;  %s2672_s26 = smov 96  }
  0x24   : > { %718 = vmatprep.subr.bf16.mxu0 %v2668_v1  ;;  %v606_v6 = vld [vmem:[%s600_s0] sm:$0xff]  ;;  %s3257_s0 = smov 80   ;;  %s2675_s24 = smov 112  }
  0x25   : > { %v2163_v7 = vcombine.high %v606_v6, %v606_v6  ;;  %v2162_v15 = vcombine.low %v606_v6, %v606_v6  ;;  %v2178_v37 = vld [vmem:[%s3276_s4] ss:$0 sm:$0xff]  ;;  %s3255_s2 = smov 16  }
  0x27   : > { %719 = vmatpush1.bf16.msra.mxu0 %v2532_v3  ;;  %2176 = vmatprep.mubr.msk.bf16.mxu0 %vm710_vm0, %v2163_v7 }
  0x28   : > { %720 = vmatprep.subr.bf16.mxu0 %v2668_v1 }
  0x2b   : > { %721 = vmatpush1.bf16.msra.mxu0 %v2533_v4 }
  0x2c   : > { %722 = vmatprep.subr.bf16.mxu0 %v2668_v1 }
  0x2f   : > { %723 = vmatpush1.bf16.msra.mxu0 %v2534_v5 }
  0x30   : > { %724 = vmatprep.subr.bf16.mxu0 %v2668_v1 }
  0x33   : > { %725 = vmatpush1.bf16.msra.mxu0 %v2535_v8 }
  0x34   : > { %726 = vmatprep.subr.bf16.mxu0 %v2668_v1 }
  0x37   : > { %727 = vmatpush1.bf16.msra.mxu0 %v2536_v9 }
  0x38   : > { %728 = vmatprep.subr.bf16.mxu0 %v2668_v1 }
  0x3b   : > { %729 = vmatpush1.bf16.msra.mxu0 %v2537_v10 }
  0x3c   : > { %730 = vmatprep.subr.bf16.mxu0 %v2668_v1 }
  0x3f   : > { %731 = vmatpush1.bf16.msra.mxu0 %v2538_v11 }
  0x40   : > { %732 = vmatprep.subr.bf16.mxu0 %v2668_v1 }
  0x43   : > { %733 = vmatpush1.bf16.msra.mxu0 %v2539_v12 }
  0x44   : > { %734 = vmatprep.subr.bf16.mxu0 %v2668_v1 }
  0x47   : > { %735 = vmatpush1.bf16.msra.mxu0 %v2540_v13 }
  0x48   : > { %736 = vmatprep.subr.bf16.mxu0 %v2668_v1 }
  0x4b   : > { %737 = vmatpush1.bf16.msra.mxu0 %v2541_v14 }
  0x4c   : > { %2405 = vmatprep.subr.bf16.mxu0 %v2669_v29 }
  0x4e   : > { %747 = vmatmul.mubr.bf16.vlgmr.msra.gmra.mrb[0].mxu0 %v2162_v15 }
  0x4f   : > { %2409 = vmatprep.mubr.msk.bf16.mxu0 %vm2670_vm2, %v2669_v29 }
 0x121   : > { %v748_v17 = vpop.f32.mrb[0].mxu0 }
 0x122   : > { %v2871_v18 = vadd.f32 %v748_v17, %v631_v16  ;;  %v750_v19 = vpop.f32.mrb[1].mxu0 }
 0x123   : > { %v751_v20 = vpop.f32.mrb[2].mxu0 }
 0x124   : > { %v752_v21 = vpop.f32.mrb[3].mxu0  ;;  %v757_v22 = vsel %vm756_vm1, %v2871_v18, 0.0 }
 0x125   : > { %758 = vadd.xlane.f32.xlu0 %v757_v22 }
 0x1b2   : > { %v759_v23 = vpop.xlane.xlu0 %758 }
 0x1b3   : > { %v761_v24 = vmul.f32 0.03125, %v759_v23 }
 0x1b5   : > { %v762_v25 = vsub.f32 %v2871_v18, %v761_v24 }
 0x1b7   : > { %v763_v26 = vmul.f32 %v762_v25, %v762_v25 }
 0x1b9   : > { %v764_v27 = vsel %vm756_vm1, %v763_v26, 0.0 }
 0x1ba   : > { %765 = vadd.xlane.f32.xlu0 %v764_v27 }
 0x247   : > { %v766_v31 = vpop.xlane.xlu0 %765 }
 0x248   : > { %v767_v32 = vmul.f32 0.03125, %v766_v31 }
 0x24a   : > { %v768_v33 = vadd.f32 1e-06, %v767_v32 }
 0x24c   : > { %2574 = vrsqrt.f32 %v768_v33  ;;  %v2546_v33 = vld [vmem:[%s3233_s7] sm:$0xff]  }
 0x256   : > { %v2575_v34 = vpop.eup %2574 }
 0x257   : > { %v770_v36 = vmul.f32 %v2575_v34, %v762_v25  ;;  %v2547_v34 = vld [vmem:[%s3233_s7 + $0x8] sm:$0xff]  }
 0x259   : > { %v777_v38 = vmul.f32 %v2177_v35, %v770_v36 }
 0x25b   : > { %v784_v39 = vadd.f32 %v2178_v37, %v777_v38 }
 0x25d   : > { %v785_v40 = vpack.c.bf16 %v784_v39, %v784_v39 }
 0x25f   : > { %2342 = vmatmul.mubr.msk.bf16.vlgmr.msra.gmra.mrb[0].mxu1 %vm756_vm1, %v785_v40 }
 0x260   : > { %2347 = vmatprep.mubr.msk.bf16.mxu1 %vm2670_vm2, %v2669_v29 }
 0x332   : > { %v846_v42 = vpop.f32.mrb[0].mxu1 }
 0x333   : > { %v847_v43 = vadd.f32 %v2179_v41, %v846_v42  ;;  %v2343_v44 = vpop.f32.mrb[1].mxu1  ;;  %v2187_v42 = vld [vmem:[%s3234_s8] ss:$0 sm:$0xff] }
 0x334   : > { %v849_v45 = vpop.f32.mrb[2].mxu1 }
 0x335   : > { %v2903_v46 = vpack.c.bf16 %v847_v43, %v847_v43  ;;  %v2344_v47 = vpop.f32.mrb[3].mxu1 }
 0x337   : > { %916 = vrot.lane.b32.xlu0 %v2903_v46, %s2671_s21  ;;  %854 = vrot.lane.b32.xlu1 %v2903_v46, %s2672_s26 }
 0x3a9   : > { %v855_v48 = vpop.permute.xlu1 %854  ;;  %v917_v50 = vpop.permute.xlu0 %916 }
 0x3aa   : > { %v861_v49 = vsel %vm856_vm3, %v855_v48, 0  ;;  %v923_v51 = vsel %vm921_vm4, %v917_v50, 0 }
 0x3ab   : > { %2346 = vmatpush3.bf16.xpose.msra.mxu1 %v861_v49 }
 0x3ac   : > { %2351 = vmatprep.subr.bf16.mxu1 %v2669_v29 }
 0x3b2   : > { %2348 = vmatmul.mubr.msk.bf16.vlgmr.msra.gmra.mrb[4].mxu1 %vm856_vm3, %v2903_v46 }
 0x3b3   : > { %2352 = vmatpush3.bf16.msra.mxu1 %v923_v51  ;;  %2353 = vmatprep.mubr.msk.bf16.mxu1 %vm2670_vm2, %v2669_v29 }
 0x3b4   : > { %2357 = vmatprep.subr.bf16.mxu1 %v2669_v29 }
 0x485   : > { %v897_v56 = vpop.f32.mrb[4].mxu1 }
 0x486   : > { %v898_v57 = vadd.f32 %v897_v56, %v2917_v55  ;;  %v2349_v58 = vpop.f32.mrb[5].mxu1  ;;  %v2548_v56 = vld [vmem:[%s3237_s11] sm:$0xff]  }
 0x487   : > { %v900_v59 = vpop.f32.mrb[6].mxu1 }
 0x488   : > { %v2350_v60 = vpop.f32.mrb[7].mxu1  ;;  %v904_v61 = vsel %vm903_vm6, %v898_v57, -inf }
 0x489   : > { %905 = vmax.xlane.f32.xlu1 %v904_v61  ;;  %v2191_v61 = vld [vmem:[%s3235_s9] ss:$0 sm:$0xff] }
 0x516   : > { %v906_v62 = vpop.xlane.xlu1 %905 }
 0x517   : > { %v907_v63 = vsub.f32 %v898_v57, %v906_v62 }
 0x519   : > { %v908_v0 = vmul.f32 1.442695, %v907_v63  ;;  %v2192_v63 = vld [vmem:[%s3236_s10] ss:$0 sm:$0xff] }
 0x51b   : > { %2576 = vpow2.f32 %v908_v0 }
 0x525   : > { %v2577_v1 = vpop.eup %2576 }
 0x526   : > { %v910_v2 = vsel %vm903_vm6, %v2577_v1, 0.0 }
 0x527   : > { %911 = vadd.xlane.f32.xlu0 %v910_v2 }
 0x53d   : > { %967 = vrot.lane.b32.xlu0 %v2903_v46, %s3257_s0 }
 0x541   : > { %965 = vrot.lane.b32.xlu0 %v2903_v46, %s2675_s24 }
 0x5b4   : > { %v912_v3 = vpop.xlane.xlu0 %911 }
 0x5b5   : > { %2578 = vrcp.f32 %v912_v3  ;;  %v2550_v3 = vld [vmem:[%s3239_s13] sm:$0xff]  }
 0x5b8   : > { %v968_v6 = vpop.permute.xlu0 %967 }
 0x5b9   : > { %v973_v8 = vsel %vm856_vm3, %v968_v6, 0  ;;  %v2553_v6 = vld [vmem:[%s3239_s13 + $0x18] sm:$0xff]  }
 0x5bc   : > { %v966_v9 = vpop.permute.xlu0 %965 }
 0x5bf   : > { %v2579_v4 = vpop.eup %2578 }
 0x5c0   : > { %v914_v5 = vmul.f32 %v2579_v4, %v2577_v1  ;;  %v2551_v4 = vld [vmem:[%s3239_s13 + $0x8] sm:$0xff]  }
 0x5c2   : > { %v915_v7 = vpack.c.bf16 %v914_v5, %v914_v5  ;;  %v2552_v5 = vld [vmem:[%s3239_s13 + $0x10] sm:$0xff]  }
 0x5c4   : > { %2354 = vmatmul.mubr.msk.bf16.vlgmr.msra.gmra.mrb[8].mxu1 %vm903_vm6, %v915_v7  ;;  %v2554_v7 = vld [vmem:[%s3239_s13 + $0x20] sm:$0xff]  }
 0x5c5   : > { %2358 = vmatpush3.bf16.xpose.msra.mxu1 %v973_v8  ;;  %2359 = vmatprep.mubr.msk.bf16.mxu1 %vm2670_vm2, %v2669_v29  ;;  %v2555_v8 = vld [vmem:[%s3239_s13 + $0x28] sm:$0xff]  }
 0x5c6   : > { %2363 = vmatprep.subr.bf16.mxu1 %v2669_v29 }
 0x5cc   : > { %2360 = vmatmul.mubr.msk.bf16.vlgmr.msra.gmra.mrb[12].mxu1 %vm856_vm3, %v966_v9  ;;  %v2556_v9 = vld [vmem:[%s3239_s13 + $0x30] sm:$0xff]  }
 0x5cd   : > { %2365 = vmatprep.mubr.msk.bf16.mxu1 %vm2670_vm2, %v2669_v29 }
 0x697   : > { %v959_v10 = vpop.f32.mrb[8].mxu1 }
 0x698   : > { %v2355_v11 = vpop.f32.mrb[9].mxu1 }
 0x699   : > { %v962_v12 = vpop.f32.mrb[10].mxu1  ;;  %v2193_v11 = vld [vmem:[%s3238_s12] ss:$0 sm:$0xff] }
 0x69a   : > { %v2356_v13 = vpop.f32.mrb[11].mxu1 }
 0x69f   : > { %v1009_v14 = vpop.f32.mrb[12].mxu1 }
 0x6a0   : > { %v1010_v15 = vadd.f32 %v1009_v14, %v2917_v55  ;;  %v2361_v16 = vpop.f32.mrb[13].mxu1 }
 0x6a1   : > { %v1012_v17 = vpop.f32.mrb[14].mxu1 }
 0x6a2   : > { %v2362_v19 = vpop.f32.mrb[15].mxu1  ;;  %v1015_v20 = vsel %vm903_vm6, %v1010_v15, -inf }
 0x6a3   : > { %1016 = vmax.xlane.f32.xlu1 %v1015_v20 }
 0x6b4   : > { %1027 = vrot.lane.b32.xlu1 %v2903_v46, %s3256_s27 }
 0x730   : > { %v1017_v21 = vpop.xlane.xlu1 %1016 }
 0x731   : > { %v1018_v22 = vsub.f32 %v1010_v15, %v1017_v21 }
 0x733   : > { %v1019_v23 = vmul.f32 1.442695, %v1018_v22 }
 0x734   : > { %v1028_v24 = vpop.permute.xlu1 %1027 }
 0x735   : > { %2580 = vpow2.f32 %v1019_v23  ;;  %v1033_v25 = vsel %vm921_vm4, %v1028_v24, 0 }
 0x736   : > { %2364 = vmatpush3.bf16.msra.mxu1 %v1033_v25 }
 0x737   : > { %2369 = vmatprep.subr.bf16.mxu1 %v2669_v29 }
 0x73f   : > { %v2581_v26 = vpop.eup %2580 }
 0x740   : > { %v1021_v27 = vsel %vm903_vm6, %v2581_v26, 0.0 }
 0x741   : > { %1022 = vadd.xlane.f32.xlu0 %v1021_v27 }
 0x7ce   : > { %v1023_v28 = vpop.xlane.xlu0 %1022 }
 0x7cf   : > { %2582 = vrcp.f32 %v1023_v28  ;;  %v2197_v28 = vld [vmem:[%s3240_s14] ss:$0 sm:$0xff] }
 0x7d9   : > { %v2583_v30 = vpop.eup %2582 }
 0x7da   : > { %v1025_v31 = vmul.f32 %v2583_v30, %v2581_v26 }
 0x7dc   : > { %v1026_v32 = vpack.c.bf16 %v1025_v31, %v1025_v31 }
 0x7de   : > { %2366 = vmatmul.mubr.msk.bf16.vlgmr.msra.gmra.mrb[16].mxu1 %vm903_vm6, %v1026_v32 }
 0x7df   : > { %2373 = vmatprep.mubr.msk.bf16.mxu1 %vm2670_vm2, %v2669_v29  ;;  %2370 = vmatpush3.bf16.msra.mxu1 %v2546_v33 }
 0x7e0   : > { %2371 = vmatprep.subr.bf16.mxu1 %v2669_v29 }
 0x7e3   : > { %2372 = vmatpush3.bf16.msra.mxu1 %v2547_v34 }
 0x7e4   : > { %2377 = vmatprep.subr.bf16.mxu1 %v2669_v29 }
 0x8b1   : > { %v1069_v35 = vpop.f32.mrb[16].mxu1 }
 0x8b2   : > { %1076 = vrot.lane.b32.xlu1 %v1069_v35, %s3255_s2  ;;  %v2367_v36 = vpop.f32.mrb[17].mxu1 }
 0x8b3   : > { %v1072_v37 = vpop.f32.mrb[18].mxu1 }
 0x8b4   : > { %v2368_v38 = vpop.f32.mrb[19].mxu1 }
 0x924   : > { %v1077_v39 = vpop.permute.xlu1 %1076 }
 0x925   : > { %v1079_v40 = vsel %vm856_vm3, %v959_v10, %v1077_v39  ;;  %v2557_v10 = vld [vmem:[%s3239_s13 + $0x38] sm:$0xff]  }
 0x926   : > { %v1080_v41 = vpack.c.bf16 %v1079_v40, %v1079_v40 }
 0x928   : > { %2374 = vmatmul.mubr.msk.bf16.vlgmr.msra.gmra.mrb[20].mxu1 %vm756_vm1, %v1080_v41 }
 0x929   : > { %2381 = vmatprep.mubr.msk.bf16.mxu1 %vm2670_vm2, %v2669_v29  ;;  %2378 = vmatpush3.bf16.msra.mxu1 %v2548_v56 }
 0x92a   : > { %2379 = vmatprep.subr.bf16.mxu1 %v2669_v29 }
 0x9fb   : > { %v1141_v43 = vpop.f32.mrb[20].mxu1 }
 0x9fc   : > { %v1142_v44 = vadd.f32 %v2187_v42, %v1141_v43  ;;  %v2375_v45 = vpop.f32.mrb[21].mxu1  ;;  %v2558_v42 = vld [vmem:[%s3231_s5 + $0x10] sm:$0xff]   ;;  %v2559_v43 = vld [vmem:[%s3231_s5 + $0x18] sm:$0xff]  }
 0x9fd   : > { %v1144_v46 = vpop.f32.mrb[22].mxu1  ;;  %2406 = vmatpush3.bf16.msra.mxu0 %v2558_v42  ;;  %v2560_v42 = vld [vmem:[%s3233_s7 + $0x10] sm:$0xff]  }
 0x9fe   : > { %v2961_v47 = vadd.f32 %v1142_v44, %v2871_v18  ;;  %v2376_v48 = vpop.f32.mrb[23].mxu1  ;;  %v2549_v18 = vld [vmem:[%s3237_s11 + $0x8] sm:$0xff]   ;;  %2407 = vmatprep.subr.bf16.mxu0 %v2669_v29 }
 0x9ff   : > { %2380 = vmatpush3.bf16.msra.mxu1 %v2549_v18  ;;  %v2208_v48 = vld [vmem:[%s3275_s23 + $0x1] ss:$0 sm:$0xff] }
 0xa00   : > { %v1150_v49 = vsel %vm756_vm1, %v2961_v47, 0.0  ;;  %2385 = vmatprep.subr.bf16.mxu1 %v2669_v29 }
 0xa01   : > { %1151 = vadd.xlane.f32.xlu1 %v1150_v49  ;;  %2408 = vmatpush3.bf16.msra.mxu0 %v2559_v43  ;;  %v2561_v43 = vld [vmem:[%s3233_s7 + $0x18] sm:$0xff]  }
 0xa02   : > { %2413 = vmatprep.subr.bf16.mxu0 %v2669_v29 }
 0xa8e   : > { %v1152_v50 = vpop.xlane.xlu1 %1151 }
 0xa8f   : > { %v1153_v51 = vmul.f32 0.03125, %v1152_v50  ;;  %v2209_v50 = vld [vmem:[%s3276_s4 + $0x1] ss:$0 sm:$0xff]  ;;  %s3281_s4 = smov %s3280_s20 }
 0xa91   : > { %v1154_v52 = vsub.f32 %v2961_v47, %v1153_v51 }
 0xa93   : > { %v1155_v53 = vmul.f32 %v1154_v52, %v1154_v52 }
 0xa95   : > { %v1156_v54 = vsel %vm756_vm1, %v1155_v53, 0.0 }
 0xa96   : > { %1157 = vadd.xlane.f32.xlu0 %v1156_v54  ;;  %v2215_v54 = vld [vmem:[%s3232_s6 + $0x1] ss:$0 sm:$0xff] }
 0xb23   : > { %v1158_v57 = vpop.xlane.xlu0 %1157 }
 0xb24   : > { %v1159_v58 = vmul.f32 0.03125, %v1158_v57 }
 0xb26   : > { %v1160_v59 = vadd.f32 1e-06, %v1159_v58 }
 0xb28   : > { %2584 = vrsqrt.f32 %v1160_v59 }
 0xb32   : > { %v2585_v60 = vpop.eup %2584 }
 0xb33   : > { %v1162_v62 = vmul.f32 %v2585_v60, %v1154_v52 }
 0xb35   : > { %v1169_v0 = vmul.f32 %v2191_v61, %v1162_v62 }
 0xb37   : > { %v1176_v1 = vadd.f32 %v2192_v63, %v1169_v0 }
 0xb39   : > { %v1177_v2 = vpack.c.bf16 %v1176_v1, %v1176_v1 }
 0xb3b   : > { %2382 = vmatmul.mubr.msk.bf16.vlgmr.msra.gmra.mrb[24].mxu1 %vm756_vm1, %v1177_v2 }
 0xb3c   : > { %2401 = vmatprep.mubr.msk.bf16.mxu1 %vm2670_vm2, %v2669_v29  ;;  %2386 = vmatpush3.bf16.msra.mxu1 %v2550_v3 }
 0xb3d   : > { %2387 = vmatprep.subr.bf16.mxu1 %v2669_v29 }
 0xb40   : > { %2388 = vmatpush3.bf16.msra.mxu1 %v2551_v4 }
 0xb41   : > { %2389 = vmatprep.subr.bf16.mxu1 %v2669_v29 }
 0xb44   : > { %2390 = vmatpush3.bf16.msra.mxu1 %v2552_v5 }
 0xb45   : > { %2391 = vmatprep.subr.bf16.mxu1 %v2669_v29 }
 0xb48   : > { %2392 = vmatpush3.bf16.msra.mxu1 %v2553_v6 }
 0xb49   : > { %2393 = vmatprep.subr.bf16.mxu1 %v2669_v29 }
 0xb4c   : > { %2394 = vmatpush3.bf16.msra.mxu1 %v2554_v7 }
 0xb4d   : > { %2395 = vmatprep.subr.bf16.mxu1 %v2669_v29 }
 0xb50   : > { %2396 = vmatpush3.bf16.msra.mxu1 %v2555_v8 }
 0xb51   : > { %2397 = vmatprep.subr.bf16.mxu1 %v2669_v29 }
 0xb54   : > { %2398 = vmatpush3.bf16.msra.mxu1 %v2556_v9 }
 0xb55   : > { %2399 = vmatprep.subr.bf16.mxu1 %v2669_v29 }
 0xb58   : > { %2400 = vmatpush3.bf16.msra.mxu1 %v2557_v10 }
 0xb59   : > { %2431 = vmatprep.subr.bf16.mxu1 %v2669_v29 }
 0xc0e   : > { %v1238_v12 = vpop.f32.mrb[24].mxu1 }
 0xc0f   : > { %v1239_v13 = vadd.f32 %v2193_v11, %v1238_v12  ;;  %v2383_v14 = vpop.f32.mrb[25].mxu1 }
 0xc10   : > { %v1241_v15 = vpop.f32.mrb[26].mxu1 }
 0xc11   : > { %v1244_v16 = vmul.f32 %v1239_v13, %v1239_v13  ;;  %v2384_v17 = vpop.f32.mrb[27].mxu1 }
 0xc13   : > { %v1245_v19 = vmul.f32 %v1244_v16, %v1239_v13 }
 0xc15   : > { %v1246_v20 = vmul.f32 0.044715, %v1245_v19 }
 0xc17   : > { %v1247_v21 = vadd.f32 %v1246_v20, %v1239_v13 }
 0xc19   : > { %v1248_v22 = vmul.f32 0.7978846, %v1247_v21 }
 0xc1b   : > { %2586 = vtanh.f32 %v1248_v22 }
 0xc25   : > { %v2587_v23 = vpop.eup %2586 }
 0xc26   : > { %v1250_v24 = vadd.f32 1.0, %v2587_v23 }
 0xc28   : > { %v1251_v25 = vmul.f32 0.5, %v1250_v24 }
 0xc2a   : > { %v1252_v26 = vmul.f32 %v1251_v25, %v1239_v13 }
 0xc2c   : > { %v1253_v27 = vpack.c.bf16 %v1252_v26, %v1252_v26 }
 0xc2e   : > { %2402 = vmatmul.mubr.bf16.vlgmr.msra.gmra.mrb[28].mxu1 %v1253_v27 }
 0xc2f   : > { %2433 = vmatprep.mubr.msk.bf16.mxu1 %vm2670_vm2, %v2669_v29 }
 0xd01   : > { %v1359_v30 = vpop.f32.mrb[28].mxu1 }
 0xd02   : > { %v1360_v31 = vadd.f32 %v2197_v28, %v1359_v30  ;;  %v2403_v32 = vpop.f32.mrb[29].mxu1 }
 0xd03   : > { %v1362_v33 = vpop.f32.mrb[30].mxu1 }
 0xd04   : > { %v3025_v34 = vadd.f32 %v1360_v31, %v2961_v47  ;;  %v2404_v35 = vpop.f32.mrb[31].mxu1 }
 0xd06   : > { %v1370_v36 = vsel %vm756_vm1, %v3025_v34, 0.0 }
 0xd07   : > { %1371 = vadd.xlane.f32.xlu0 %v1370_v36 }
 0xd94   : > { %v1372_v37 = vpop.xlane.xlu0 %1371 }
 0xd95   : > { %v1373_v38 = vmul.f32 0.03125, %v1372_v37 }
 0xd97   : > { %v1374_v39 = vsub.f32 %v3025_v34, %v1373_v38 }
 0xd99   : > { %v1375_v40 = vmul.f32 %v1374_v39, %v1374_v39 }
 0xd9b   : > { %v1376_v41 = vsel %vm756_vm1, %v1375_v40, 0.0 }
 0xd9c   : > { %1377 = vadd.xlane.f32.xlu0 %v1376_v41 }
 0xe29   : > { %v1378_v44 = vpop.xlane.xlu0 %1377 }
 0xe2a   : > { %v1379_v45 = vmul.f32 0.03125, %v1378_v44 }
 0xe2c   : > { %v1380_v46 = vadd.f32 1e-06, %v1379_v45 }
 0xe2e   : > { %2588 = vrsqrt.f32 %v1380_v46 }
 0xe38   : > { %v2589_v47 = vpop.eup %2588 }
 0xe39   : > { %v1382_v49 = vmul.f32 %v2589_v47, %v1374_v39 }
 0xe3b   : > { %v1389_v51 = vmul.f32 %v2208_v48, %v1382_v49 }
 0xe3d   : > { %v1396_v52 = vadd.f32 %v2209_v50, %v1389_v51  ;;  %v2228_v51 = vld [vmem:[%s3234_s8 + $0x1] ss:$0 sm:$0xff] }
 0xe3f   : > { %v1397_v53 = vpack.c.bf16 %v1396_v52, %v1396_v52 }
 0xe41   : > { %2410 = vmatmul.mubr.msk.bf16.vlgmr.msra.gmra.mrb[4].mxu0 %vm756_vm1, %v1397_v53 }
 0xe42   : > { %2415 = vmatprep.mubr.msk.bf16.mxu0 %vm2670_vm2, %v2669_v29 }
 0xf14   : > { %v1460_v56 = vpop.f32.mrb[4].mxu0 }
 0xf15   : > { %v1461_v18 = vadd.f32 %v2215_v54, %v1460_v56  ;;  %v2411_v57 = vpop.f32.mrb[5].mxu0 }
 0xf16   : > { %v1463_v58 = vpop.f32.mrb[6].mxu0 }
 0xf17   : > { %v1466_v59 = vpack.c.bf16 %v1461_v18, %v1461_v18  ;;  %v2412_v60 = vpop.f32.mrb[7].mxu0 }
 0xf19   : > { %1468 = vrot.lane.b32.xlu0 %v1466_v59, %s2672_s26  ;;  %s3278_s26 = smov 48  }
 0xf1d   : > { %1528 = vrot.lane.b32.xlu0 %v1466_v59, %s2671_s21  ;;  %s3277_s21 = smov 80  }
 0xf21   : > { %1576 = vrot.lane.b32.xlu0 %v1466_v59, %s2675_s24 }
 0xf8b   : > { %v1469_v61 = vpop.permute.xlu0 %1468 }
 0xf8c   : > { %v1474_v62 = vsel %vm856_vm3, %v1469_v61, 0 }
 0xf8d   : > { %2414 = vmatpush3.bf16.xpose.msra.mxu0 %v1474_v62 }
 0xf8e   : > { %2419 = vmatprep.subr.bf16.mxu0 %v2669_v29 }
 0xf8f   : > { %v1529_v63 = vpop.permute.xlu0 %1528 }
 0xf90   : > { %v1534_v0 = vsel %vm921_vm4, %v1529_v63, 0 }
 0xf93   : > { %v1577_v19 = vpop.permute.xlu0 %1576 }
 0xf94   : > { %2416 = vmatmul.mubr.msk.bf16.vlgmr.msra.gmra.mrb[8].mxu0 %vm856_vm3, %v1466_v59 }
 0xf95   : > { %2420 = vmatpush3.bf16.msra.mxu0 %v1534_v0  ;;  %2421 = vmatprep.mubr.msk.bf16.mxu0 %vm2670_vm2, %v2669_v29  ;;  %v2562_v0 = vld [vmem:[%s3237_s11 + $0x10] sm:$0xff]  }
 0xf96   : > { %2425 = vmatprep.subr.bf16.mxu0 %v2669_v29 }
0x1067   : > { %v1510_v1 = vpop.f32.mrb[8].mxu0 }
0x1068   : > { %v1511_v2 = vadd.f32 %v1510_v1, %v2917_v55  ;;  %v2417_v3 = vpop.f32.mrb[9].mxu0 }
0x1069   : > { %v1513_v4 = vpop.f32.mrb[10].mxu0 }
0x106a   : > { %v2418_v5 = vpop.f32.mrb[11].mxu0  ;;  %v1516_v6 = vsel %vm903_vm6, %v1511_v2, -inf }
0x106b   : > { %1517 = vmax.xlane.f32.xlu1 %v1516_v6  ;;  %v2234_v5 = vld [vmem:[%s3235_s9 + $0x1] ss:$0 sm:$0xff] }
0x10f8   : > { %v1518_v7 = vpop.xlane.xlu1 %1517 }
0x10f9   : > { %v1519_v8 = vsub.f32 %v1511_v2, %v1518_v7  ;;  %v2235_v7 = vld [vmem:[%s3236_s10 + $0x1] ss:$0 sm:$0xff] }
0x10fb   : > { %v1520_v9 = vmul.f32 1.442695, %v1519_v8 }
0x10fd   : > { %2590 = vpow2.f32 %v1520_v9 }
0x1107   : > { %v2591_v10 = vpop.eup %2590 }
0x1108   : > { %v1522_v11 = vsel %vm903_vm6, %v2591_v10, 0.0 }
0x1109   : > { %1523 = vadd.xlane.f32.xlu1 %v1522_v11  ;;  %v2564_v11 = vld [vmem:[%s3239_s13 + $0x40] sm:$0xff]  }
0x111a   : > { %1578 = vrot.lane.b32.xlu1 %v1466_v59, %s3277_s21  ;;  %s3184_s21 = scalar_lea.hbm %s3280_s20, %s2278_s25 }
0x1196   : > { %v1524_v12 = vpop.xlane.xlu1 %1523 }
0x1197   : > { %2592 = vrcp.f32 %v1524_v12  ;;  %v2565_v12 = vld [vmem:[%s3239_s13 + $0x48] sm:$0xff]  }
0x119a   : > { %v1579_v15 = vpop.permute.xlu1 %1578 }
0x119b   : > { %v1584_v17 = vsel %vm856_vm3, %v1579_v15, 0  ;;  %v2568_v15 = vld [vmem:[%s3239_s13 + $0x60] sm:$0xff]  }
0x11a1   : > { %v2593_v13 = vpop.eup %2592 }
0x11a2   : > { %v1526_v14 = vmul.f32 %v2593_v13, %v2591_v10  ;;  %v2566_v13 = vld [vmem:[%s3239_s13 + $0x50] sm:$0xff]  }
0x11a4   : > { %v1527_v16 = vpack.c.bf16 %v1526_v14, %v1526_v14  ;;  %v2567_v14 = vld [vmem:[%s3239_s13 + $0x58] sm:$0xff]  }
0x11a6   : > { %2422 = vmatmul.mubr.msk.bf16.vlgmr.msra.gmra.mrb[12].mxu0 %vm903_vm6, %v1527_v16  ;;  %v2569_v16 = vld [vmem:[%s3239_s13 + $0x68] sm:$0xff]  }
0x11a7   : > { %2426 = vmatpush3.bf16.xpose.msra.mxu0 %v1584_v17  ;;  %2427 = vmatprep.mubr.msk.bf16.mxu0 %vm2670_vm2, %v2669_v29  ;;  %v2570_v17 = vld [vmem:[%s3239_s13 + $0x70] sm:$0xff]  }
0x11a8   : > { %2437 = vmatprep.subr.bf16.mxu0 %v2669_v29 }
0x11ae   : > { %2428 = vmatmul.mubr.msk.bf16.vlgmr.msra.gmra.mrb[16].mxu0 %vm856_vm3, %v1577_v19  ;;  %v2571_v19 = vld [vmem:[%s3239_s13 + $0x78] sm:$0xff]  }
0x11af   : > { %2441 = vmatprep.mubr.msk.bf16.mxu0 %vm2670_vm2, %v2669_v29  ;;  %2438 = vmatpush3.bf16.msra.mxu0 %v2560_v42 }
0x11b0   : > { %2439 = vmatprep.subr.bf16.mxu0 %v2669_v29 }
0x11b3   : > { %2440 = vmatpush3.bf16.msra.mxu0 %v2561_v43 }
0x11b4   : > { %2453 = vmatprep.subr.bf16.mxu0 %v2669_v29 }
0x1279   : > { %v1570_v20 = vpop.f32.mrb[12].mxu0 }
0x127a   : > { %v2423_v21 = vpop.f32.mrb[13].mxu0 }
0x127b   : > { %v1573_v22 = vpop.f32.mrb[14].mxu0 }
0x127c   : > { %v2424_v23 = vpop.f32.mrb[15].mxu0 }
0x1281   : > { %v1620_v24 = vpop.f32.mrb[16].mxu0 }
0x1282   : > { %v1621_v25 = vadd.f32 %v1620_v24, %v2917_v55  ;;  %v2429_v26 = vpop.f32.mrb[17].mxu0 }
0x1283   : > { %v1623_v27 = vpop.f32.mrb[18].mxu0 }
0x1284   : > { %v2430_v28 = vpop.f32.mrb[19].mxu0  ;;  %v1626_v30 = vsel %vm903_vm6, %v1621_v25, -inf }
0x1285   : > { %1627 = vmax.xlane.f32.xlu0 %v1626_v30 }
0x129b   : > { %1638 = vrot.lane.b32.xlu0 %v1466_v59, %s3278_s26  ;;  %s593_s26 = sand.u32 1, %s2658_s30  }
0x129c   : > { %s2159_s24 = sshll.u32 %s593_s26, 3  ;;  %s2083_s27 = scalar_lea.sflag [#allocation3], %s593_s26 }
0x1312   : > { %v1628_v31 = vpop.xlane.xlu0 %1627 }
0x1313   : > { %v1629_v32 = vsub.f32 %v1621_v25, %v1628_v31 }
0x1315   : > { %v1630_v33 = vmul.f32 1.442695, %v1629_v32 }
0x1316   : > { %v1639_v35 = vpop.permute.xlu0 %1638 }
0x1317   : > { %2594 = vpow2.f32 %v1630_v33  ;;  %v1644_v36 = vsel %vm921_vm4, %v1639_v35, 0 }
0x1318   : > { %2432 = vmatpush3.bf16.msra.mxu1 %v1644_v36 }
0x1319   : > { %2445 = vmatprep.subr.bf16.mxu1 %v2669_v29 }
0x1321   : > { %v2595_v37 = vpop.eup %2594 }
0x1322   : > { %v1632_v55 = vsel %vm903_vm6, %v2595_v37, 0.0 }
0x1323   : > { %1633 = vadd.xlane.f32.xlu1 %v1632_v55  ;;  %v2262_v55 = vld [vmem:[%s3240_s14 + $0x1] ss:$0 sm:$0xff] }
0x13b0   : > { %v1634_v38 = vpop.xlane.xlu1 %1633 }
0x13b1   : > { %2596 = vrcp.f32 %v1634_v38 }
0x13bb   : > { %v2597_v39 = vpop.eup %2596 }
0x13bc   : > { %v1636_v40 = vmul.f32 %v2597_v39, %v2595_v37 }
0x13be   : > { %v1637_v41 = vpack.c.bf16 %v1636_v40, %v1636_v40 }
0x13c0   : > { %2434 = vmatmul.mubr.msk.bf16.vlgmr.msra.gmra.mrb[32].mxu1 %vm903_vm6, %v1637_v41 }
0x13c1   : > { %2449 = vmatprep.mubr.msk.bf16.mxu1 %vm2670_vm2, %v2669_v29  ;;  %2446 = vmatpush3.bf16.msra.mxu1 %v2562_v0 }
0x13c2   : > { %2447 = vmatprep.subr.bf16.mxu1 %v2669_v29 }
0x1493   : > { %v1680_v44 = vpop.f32.mrb[32].mxu1 }
0x1494   : > { %1687 = vrot.lane.b32.xlu1 %v1680_v44, %s3279_s19  ;;  %v2435_v45 = vpop.f32.mrb[33].mxu1  ;;  %s595_s19 = scalar_lea.vmem [#allocation2], %s2159_s24  ;;  %s2678_s24 = smov [#allocation2]  }
0x1495   : > { %v1683_v46 = vpop.f32.mrb[34].mxu1  ;;  %s2096_s2 = sshll.u32 %s595_s19, 4  ;;  %s2608_s0 = sshll.u32 %s2678_s24, 4  ;;  %s3186_s2 = int_to_ptr.vmem [resolvable:$true] %s2096_s2  ;;  %s2609_s0 = int_to_ptr.vmem [resolvable:$false] %s2608_s0 }
0x1496   : > { %v2436_v47 = vpop.f32.mrb[35].mxu1  ;;  %s2604_s1 = scalar_lea.vmem %s3186_s2, 128  ;;  %s2610_s28 = scalar_lea.vmem %s2609_s0, 256 }
0x1497   : > { %p2605_p11 = scmp.ne.s32.totalorder %s3186_s2, %s2604_s1  ;;  %p2611_p0 = scmp.lt.s32.totalorder %s3186_s2, %s2609_s0 }
0x1498   : > { %p2612_p1 = scmp.lt.s32.totalorder %s2610_s28, %s2604_s1 }
0x1499   : > { %p2606_p12 = pnand %p2605_p11, %p2817_p5 }
0x149a   : > { %p2613_p2 = por %p2612_p1, %p2611_p0 }
0x149b   : > { %p2607_p13 = pneg %p2606_p12 }
0x149d   : > { %p2614_p3 = pnand %p2613_p2, %p2607_p13 }
0x1506   : > { %v1688_v48 = vpop.permute.xlu1 %1687 }
0x1507   : > { %v1690_v49 = vsel %vm856_vm3, %v1570_v20, %v1688_v48  ;;  %v2241_v20 = vld [vmem:[%s3238_s12 + $0x1] ss:$0 sm:$0xff] }
0x1508   : > { %v1691_v50 = vpack.c.bf16 %v1690_v49, %v1690_v49 }
0x150a   : > { %2442 = vmatmul.mubr.msk.bf16.vlgmr.msra.gmra.mrb[20].mxu0 %vm756_vm1, %v1691_v50  ;;  %v2572_v50 = vld [vmem:[%s3243_s17] sm:$0xff]  }
0x150b   : > { %2469 = vmatprep.mubr.msk.bf16.mxu0 %vm2670_vm2, %v2669_v29  ;;  %2454 = vmatpush3.bf16.msra.mxu0 %v2564_v11 }
0x150c   : > { %2455 = vmatprep.subr.bf16.mxu0 %v2669_v29 }
0x150f   : > { %2456 = vmatpush3.bf16.msra.mxu0 %v2565_v12 }
0x1510   : > { %2457 = vmatprep.subr.bf16.mxu0 %v2669_v29 }
0x1513   : > { %2458 = vmatpush3.bf16.msra.mxu0 %v2566_v13 }
0x1514   : > { %2459 = vmatprep.subr.bf16.mxu0 %v2669_v29 }
0x1517   : > { %2460 = vmatpush3.bf16.msra.mxu0 %v2567_v14 }
0x1518   : > { %2461 = vmatprep.subr.bf16.mxu0 %v2669_v29 }
0x151b   : > { %2462 = vmatpush3.bf16.msra.mxu0 %v2568_v15 }
0x151c   : > { %2463 = vmatprep.subr.bf16.mxu0 %v2669_v29 }
0x151f   : > { %2464 = vmatpush3.bf16.msra.mxu0 %v2569_v16 }
0x1520   : > { %2465 = vmatprep.subr.bf16.mxu0 %v2669_v29 }
0x1523   : > { %2466 = vmatpush3.bf16.msra.mxu0 %v2570_v17 }
0x1524   : > { %2467 = vmatprep.subr.bf16.mxu0 %v2669_v29 }
0x1527   : > { %2468 = vmatpush3.bf16.msra.mxu0 %v2571_v19 }
0x15dd   : > { %v1754_v52 = vpop.f32.mrb[20].mxu0 }
0x15de   : > { %v1755_v53 = vadd.f32 %v2228_v51, %v1754_v52  ;;  %v2443_v54 = vpop.f32.mrb[21].mxu0  ;;  %v2573_v51 = vld [vmem:[%s3243_s17 + $0x8] sm:$0xff]  }
0x15df   : > { %v1757_v56 = vpop.f32.mrb[22].mxu0 }
0x15e0   : > { %v3099_v18 = vadd.f32 %v1755_v53, %v3025_v34  ;;  %v2444_v57 = vpop.f32.mrb[23].mxu0  ;;  %v2563_v34 = vld [vmem:[%s3237_s11 + $0x18] sm:$0xff]  }
0x15e1   : > { %2448 = vmatpush3.bf16.msra.mxu1 %v2563_v34 }
0x15e2   : > { %v1765_v58 = vsel %vm756_vm1, %v3099_v18, 0.0  ;;  %2473 = vmatprep.subr.bf16.mxu1 %v2669_v29 }
0x15e3   : > { %1766 = vadd.xlane.f32.xlu0 %v1765_v58  ;;  %v2272_v58 = vld [vmem:[%s3242_s16] ss:$0 sm:$0xff] }
0x1670   : > { %v1767_v59 = vpop.xlane.xlu0 %1766 }
0x1671   : > { %v1768_v60 = vmul.f32 0.03125, %v1767_v59 }
0x1673   : > { %v1769_v61 = vsub.f32 %v3099_v18, %v1768_v60 }
0x1675   : > { %v1770_v62 = vmul.f32 %v1769_v61, %v1769_v61 }
0x1677   : > { %v1771_v63 = vsel %vm756_vm1, %v1770_v62, 0.0 }
0x1678   : > { %1772 = vadd.xlane.f32.xlu1 %v1771_v63 }
0x1705   : > { %v1773_v1 = vpop.xlane.xlu1 %1772 }
0x1706   : > { %v1774_v2 = vmul.f32 0.03125, %v1773_v1 }
0x1708   : > { %v1775_v3 = vadd.f32 1e-06, %v1774_v2 }
0x170a   : > { %2598 = vrsqrt.f32 %v1775_v3 }
0x1714   : > { %v2599_v4 = vpop.eup %2598 }
0x1715   : > { %v1777_v6 = vmul.f32 %v2599_v4, %v1769_v61 }
0x1717   : > { %v1784_v8 = vmul.f32 %v2234_v5, %v1777_v6 }
0x1719   : > { %v1791_v9 = vadd.f32 %v2235_v7, %v1784_v8 }
0x171b   : > { %v1792_v10 = vpack.c.bf16 %v1791_v9, %v1791_v9 }
0x171d   : > { %2450 = vmatmul.mubr.msk.bf16.vlgmr.msra.gmra.mrb[36].mxu1 %vm756_vm1, %v1792_v10 }
0x171e   : > { %2477 = vmatprep.mubr.msk.bf16.mxu1 %vm2670_vm2, %v2669_v29  ;;  %2474 = vmatpush3.bf16.msra.mxu1 %v2572_v50 }
0x171f   : > { %2475 = vmatprep.subr.bf16.mxu1 %v2669_v29  ;;  %v2273_v29 = vld [vmem:[%s3244_s18] ss:$0 sm:$0xff] }
0x1722   : > { %2476 = vmatpush3.bf16.msra.mxu1 %v2573_v51 }
0x17f0   : > { %v1855_v21 = vpop.f32.mrb[36].mxu1 }
0x17f1   : > { %v1856_v22 = vadd.f32 %v2241_v20, %v1855_v21  ;;  %v2451_v23 = vpop.f32.mrb[37].mxu1 }
0x17f2   : > { %v1858_v24 = vpop.f32.mrb[38].mxu1 }
0x17f3   : > { %v1861_v25 = vmul.f32 %v1856_v22, %v1856_v22  ;;  %v2452_v26 = vpop.f32.mrb[39].mxu1 }
0x17f5   : > { %v1862_v27 = vmul.f32 %v1861_v25, %v1856_v22 }
0x17f7   : > { %v1863_v28 = vmul.f32 0.044715, %v1862_v27 }
0x17f9   : > { %v1864_v30 = vadd.f32 %v1863_v28, %v1856_v22 }
0x17fb   : > { %v1865_v31 = vmul.f32 0.7978846, %v1864_v30 }
0x17fd   : > { %2600 = vtanh.f32 %v1865_v31 }
0x1807   : > { %v2601_v32 = vpop.eup %2600 }
0x1808   : > { %v1867_v33 = vadd.f32 1.0, %v2601_v32 }
0x180a   : > { %v1868_v35 = vmul.f32 0.5, %v1867_v33 }
0x180c   : > { %v1869_v36 = vmul.f32 %v1868_v35, %v1856_v22 }
0x180e   : > { %v1870_v37 = vpack.c.bf16 %v1869_v36, %v1869_v36 }
0x1810   : > { %2470 = vmatmul.mubr.bf16.vlgmr.msra.gmra.mrb[24].mxu0 %v1870_v37 }
0x18e3   : > { %v1978_v38 = vpop.f32.mrb[24].mxu0 }
0x18e4   : > { %v1979_v39 = vadd.f32 %v2262_v55, %v1978_v38  ;;  %v2471_v40 = vpop.f32.mrb[25].mxu0 }
0x18e5   : > { %v1981_v41 = vpop.f32.mrb[26].mxu0 }
0x18e6   : > { %v2472_v42 = vpop.f32.mrb[27].mxu0  ;;  %v1984_v43 = vadd.f32 %v1979_v39, %v3099_v18  ;;  %v2271_v18 = vld [vmem:[%s3241_s15] ss:$0 sm:$0xff] }
0x18e8   : > { %v1987_v44 = vsel %vm756_vm1, %v1984_v43, 0.0 }
0x18e9   : > { %1988 = vadd.xlane.f32.xlu0 %v1987_v44 }
0x1976   : > { %v1989_v45 = vpop.xlane.xlu0 %1988 }
0x1977   : > { %v1990_v46 = vmul.f32 0.03125, %v1989_v45 }
0x1979   : > { %v1991_v47 = vsub.f32 %v1984_v43, %v1990_v46 }
0x197b   : > { %v1992_v48 = vmul.f32 %v1991_v47, %v1991_v47 }
0x197d   : > { %v1993_v49 = vsel %vm756_vm1, %v1992_v48, 0.0 }
0x197e   : > { %1994 = vadd.xlane.f32.xlu0 %v1993_v49 }
0x1a0b   : > { %v1995_v52 = vpop.xlane.xlu0 %1994 }
0x1a0c   : > { %v1996_v53 = vmul.f32 0.03125, %v1995_v52 }
0x1a0e   : > { %v1997_v54 = vadd.f32 1e-06, %v1996_v53 }
0x1a10   : > { %2602 = vrsqrt.f32 %v1997_v54 }
0x1a1a   : > { %v2603_v56 = vpop.eup %2602 }
0x1a1b   : > { %v1999_v57 = vmul.f32 %v2603_v56, %v1991_v47 }
0x1a1d   : > { %v2006_v59 = vmul.f32 %v2271_v18, %v1999_v57 }
0x1a1f   : > { %v2013_v60 = vadd.f32 %v2272_v58, %v2006_v59 }
0x1a21   : > { %v2014_v61 = vpack.c.bf16 %v2013_v60, %v2013_v60 }
0x1a23   : > { %2478 = vmatmul.mubr.msk.bf16.vlgmr.msra.gmra.mrb[40].mxu1 %vm756_vm1, %v2014_v61 }
0x1af6   : > { %v2075_v62 = vpop.f32.mrb[40].mxu1 }
0x1af7   : > { %v2076_v63 = vadd.f32 %v2273_v29, %v2075_v62  ;;  %v2479_v0 = vpop.f32.mrb[41].mxu1 }
0x1af8   : > { %v2078_v34 = vpop.f32.mrb[42].mxu1 }
0x1af9   : > { %2081 = vst [vmem:[%s595_s19] sm:$0xff] %v2076_v63  ;;  %v2480_v1 = vpop.f32.mrb[43].mxu1 }
0x1afa   : > { %2617 = shalt.err (!%p2614_p3)
}
0x1afb   : > { %s2618_s26 = scalar_lea.hbm %s3184_s21, 128  ;;  %s2622_s22 = scalar_lea.hbm %s3281_s4, 256 }
0x1afc   : > { %p2619_p4 = scmp.ne.s32.totalorder %s3184_s21, %s2618_s26  ;;  %p2623_p9 = scmp.lt.u32.totalorder %s3184_s21, %s3281_s4 }
0x1afd   : > { %p2624_p10 = scmp.lt.u32.totalorder %s2622_s22, %s2618_s26  ;;  %p2626_p12 = scmp.lt.u32.totalorder %s2618_s26, %s3184_s21 }
0x1afe   : > { %p2620_p7 = pnand %p2619_p4, %p2817_p5 }
0x1aff   : > { %p2625_p11 = por %p2624_p10, %p2623_p9 }
0x1b00   : > { %p2621_p8 = pneg %p2620_p7 }
0x1b01   : > { %p2627_p13 = por %p2626_p12, %p2625_p11 }
0x1b03   : > { %p2628_p0 = pnand %p2627_p13, %p2621_p8 }
0x1b05   : > { %2631 = shalt.err (!%p2628_p0)
}
0x1b06   : > { %2481 = dma.vmem_to_hbm [thread:$0]  (%p2817_p5), %s3186_s2, 128, %s3184_s21, %s2083_s27  }
0x1b07 PF: > { %s3282_s1 = sld [smem:[#allocation7_spill]]  ;;  %s3283_s0 = sld [smem:[#allocation5_spill]] }
0x1b0d   : > { %p2487_p1 = scmp.ge.s32.totalorder %s3282_s1, 2  ;;  %s2108_s25 = sand.u32 1, %s3283_s0  }
0x1b0e   : > { %s2109_s19 = scalar_lea.sflag [#allocation3], %s2108_s25 }
0x1b0f   : > { %p2484_p2 = pnand %p2487_p1, %p2821_p6 }
0x1b11   : > { %2649 = dma.done.wait (!%p2484_p2), %s2109_s19, 128  }
0x1b12   : > { %2651 = vsyncadd (!%p2484_p2), %s2109_s19, 4294967168  ;;  %s3285_s21 = sld [smem:[#allocation8_spill]]  ;;  %s3286_s26 = sld [smem:[#allocation6_spill]] }
0x1b13   : > { %s3287_s20 = sld [smem:[#allocation9_spill]]  ;;  %s3288_s0 = smov %s2658_s30 }
0x1b18   : > { %p29_p3 = scmp.ge.s32.totalorder %s3285_s21, 4   ;;  %s3289_s30 = smov %s3286_s26 }
0x1b1a   :  { %31 = sbr.rel (!%p29_p3) target bundleno = 10 (0xa), region = 143 }
0x1b21   :  { %2114 = vsyncpa [#allocation3], 1 }
0x1b22   :  { %2116 = vsyncpa [#allocation3 + $0x1], 1 }

</bundles_post_ra>
